<compile_context>
chip_gen: v6e
topology: v6e:2x2x1
jax: 0.10.0
libtpu: 0.0.40
codegen_flags: <defaults>
</compile_context>

<pallas_src>
import functools

import jax
import jax.numpy as jnp
from jax.experimental import pallas as pl
from jax.experimental.pallas import tpu as pltpu

_BN_EPS = 1e-5
_LANE = 128


def _round_up(x, m):
    return ((x + m - 1) // m) * m


def _pad_axis(x, axis, target):
    pad = target - x.shape[axis]
    if pad == 0:
        return x
    widths = [(0, 0)] * x.ndim
    widths[axis] = (0, pad)
    return jnp.pad(x, widths)


# ----------------------------------------------------------------------------
# Pallas kernel:  y = patches @ w + bias  [+ skip]  [ReLU]
# (BN scale is pre-folded into `w`; skip-conv, when present, is pre-folded
#  into `patches`/`w` columns, so the kernel body is a single MXU matmul.)
# ----------------------------------------------------------------------------
def _fused_matmul_kernel(apply_relu, has_skip, x_ref, w_ref, b_ref, *rest):
    if has_skip:
        skip_ref, out_ref = rest
    else:
        (out_ref,) = rest

    y = jnp.dot(x_ref[...], w_ref[...], preferred_element_type=jnp.float32)
    y = y + b_ref[...]
    if has_skip:
        y = y + skip_ref[...].astype(jnp.float32)
    if apply_relu:
        y = jnp.maximum(y, 0.0)
    out_ref[...] = y.astype(out_ref.dtype)


def fused_matmul(patches, w, bias, *, skip=None, relu=True,
                 out_dtype=jnp.float32, tm=1024):
    """patches: (M, K) bf16;  w: (K, Cout_p) bf16;  bias: (1, Cout_p) f32;
    optional skip: (M, Cout_p) residual added before ReLU.
    Returns (M, Cout_p) in out_dtype."""
    M, K = patches.shape
    Cout_p = w.shape[1]
    assert K == w.shape[0]
    has_skip = skip is not None

    # --- tile size: large lane-dense M tiles, capped by a safe VMEM budget --
    out_bytes = jnp.dtype(out_dtype).itemsize
    bytes_per_row = K * patches.dtype.itemsize + Cout_p * out_bytes
    if has_skip:
        bytes_per_row += Cout_p * skip.dtype.itemsize
    weight_bytes = K * Cout_p * w.dtype.itemsize + Cout_p * 4  # resident

    tm = min(tm, _round_up(M, 8))
    budget = 24 * 1024 * 1024            # double-buffered working-set cap
    while tm > 8 and weight_bytes + 2 * tm * bytes_per_row > budget:
        tm //= 2
    Mp = _round_up(M, tm)                # ragged tiles handled by zero-pad

    patches = _pad_axis(patches, 0, Mp)

    in_specs = [
        pl.BlockSpec((tm, K), lambda i: (i, 0)),
        pl.BlockSpec((K, Cout_p), lambda i: (0, 0)),   # resident across grid
        pl.BlockSpec((1, Cout_p), lambda i: (0, 0)),   # resident across grid
    ]
    args = [patches, w, bias]
    if has_skip:
        skip = _pad_axis(skip, 0, Mp)
        in_specs.append(pl.BlockSpec((tm, Cout_p), lambda i: (i, 0)))
        args.append(skip)

    kernel = functools.partial(_fused_matmul_kernel, relu, has_skip)
    out = pl.pallas_call(
        kernel,
        out_shape=jax.ShapeDtypeStruct((Mp, Cout_p), out_dtype),
        grid=(Mp // tm,),
        in_specs=in_specs,
        out_specs=pl.BlockSpec((tm, Cout_p), lambda i: (i, 0)),
        compiler_params=pltpu.CompilerParams(
            dimension_semantics=("parallel",),
            vmem_limit_bytes=48 * 1024 * 1024),
    )(*args)
    return out[:M]


# ----------------------------------------------------------------------------
# Host-side glue: im2col (tap-folded), BN folding, weight reshape
# ----------------------------------------------------------------------------
def _im2col_3x3x3(x, padding):
    """x: (N, D, H, W, C) -> (N*Do*Ho*Wo, 27*C), tap-major column order."""
    N, D, H, W, C = x.shape
    p = padding
    xp = jnp.pad(x, ((0, 0), (p, p), (p, p), (p, p), (0, 0)))
    Do, Ho, Wo = D + 2 * p - 2, H + 2 * p - 2, W + 2 * p - 2
    cols = []
    for kd in range(3):
        for kh in range(3):
            for kw in range(3):
                cols.append(xp[:, kd:kd + Do, kh:kh + Ho, kw:kw + Wo, :])
    patches = jnp.concatenate(cols, axis=-1).reshape(N * Do * Ho * Wo, 27 * C)
    return patches, (N, Do, Ho, Wo)


def _bn_fold(bn_params, conv_bias):
    """Return (scale, bias) so that BN(conv(x)+b) == conv(x)*scale + bias."""
    gamma, beta, mean, var = bn_params
    s = gamma / jnp.sqrt(var + _BN_EPS)
    b = beta + (conv_bias - mean) * s
    return s, b


def _w3x3x3_scaled(w_oidhw, scale):
    """(Cout, Cin, 3, 3, 3) * per-out-channel scale -> (27*Cin, Cout)."""
    cout, cin = w_oidhw.shape[:2]
    wm = jnp.transpose(w_oidhw, (2, 3, 4, 1, 0)).reshape(27 * cin, cout)
    return wm * scale.reshape(1, cout)


def _w1x1x1_scaled(w_oidhw, scale):
    cout, cin = w_oidhw.shape[:2]
    return w_oidhw.reshape(cout, cin).T * scale.reshape(1, cout)


# ----------------------------------------------------------------------------
# Res3dBlock forward
# ----------------------------------------------------------------------------
def res3d_block(x_ncdhw, params, padding=1, tm=1024):
    assert padding in (0, 1)
    x = jnp.transpose(x_ncdhw, (0, 2, 3, 4, 1)).astype(jnp.bfloat16)  # NDHWC
    N, D, H, W, Cin = x.shape
    Cout = params['w1'].shape[0]
    Cout_p = _round_up(Cout, _LANE)

    # --- conv1 + BN1 + ReLU: one matmul, BN scale folded into weights -------
    s1, b1 = _bn_fold(params['bn1'], params['b1'])
    p1, (_, D1, H1, W1) = _im2col_3x3x3(x, padding)
    K1p = _round_up(p1.shape[1], _LANE)
    p1 = _pad_axis(p1, 1, K1p)
    w1 = _pad_axis(_pad_axis(_w3x3x3_scaled(params['w1'], s1), 0, K1p), 1, Cout_p)
    b1p = _pad_axis(b1.reshape(1, -1), 1, Cout_p).astype(jnp.float32)
    h1 = fused_matmul(p1, w1.astype(jnp.bfloat16), b1p,
                      relu=True, out_dtype=jnp.bfloat16, tm=tm)
    h1_vol = h1[:, :Cout].reshape(N, D1, H1, W1, Cout)

    # --- conv2 + BN2 + skip (+BN) + add + ReLU: one matmul ------------------
    s2, b2 = _bn_fold(params['bn2'], params['b2'])
    p2, (_, D2, H2, W2) = _im2col_3x3x3(h1_vol, padding)
    w2 = _w3x3x3_scaled(params['w2'], s2)            # (27*Cout, Cout)
    bias = b2

    x_skip = x if padding == 1 else x[:, 2:-2, 2:-2, 2:-2, :]

    if 'ws' in params:
        # 1x1x1 skip conv + BN folded into the conv2 matmul: append skip
        # channels to the contraction dim, stack its weights under w2.
        ss, bs = _bn_fold(params['bns'], params['bs'])
        ws = _w1x1x1_scaled(params['ws'], ss)        # (Cin, Cout)
        p2 = jnp.concatenate([p2, x_skip.reshape(-1, Cin)], axis=1)
        w2 = jnp.concatenate([w2, ws], axis=0)
        bias = bias + bs
        skip = None
    else:
        # identity skip: fused VALU add inside the kernel
        skip = _pad_axis(x_skip.reshape(-1, Cout), 1, Cout_p)

    K2p = _round_up(p2.shape[1], _LANE)
    p2 = _pad_axis(p2, 1, K2p).astype(jnp.bfloat16)
    w2 = _pad_axis(_pad_axis(w2, 0, K2p), 1, Cout_p).astype(jnp.bfloat16)
    biasp = _pad_axis(bias.reshape(1, -1), 1, Cout_p).astype(jnp.float32)

    out = fused_matmul(p2, w2, biasp, skip=skip, relu=True,
                       out_dtype=jnp.float32, tm=tm)
    out = out[:, :Cout].reshape(N, D2, H2, W2, Cout)
    return jnp.transpose(out, (0, 4, 1, 2, 3))       # back to NCDHW


# ----------------------------------------------------------------------------
# Deterministic parameter init (matches nn.Module shapes)
# ----------------------------------------------------------------------------
def init_res3d_params(key, in_planes, out_planes):
    ks = jax.random.split(key, 10)

    def conv_w(k, cout, cin, ksz):
        fan_in = cin * ksz ** 3
        return jax.random.normal(
            k, (cout, cin, ksz, ksz, ksz), jnp.float32) / jnp.sqrt(fan_in)

    def bn(k, c):
        gamma = 1.0 + 0.1 * jax.random.normal(k, (c,), jnp.float32)
        beta = 0.1 * jax.random.normal(jax.random.fold_in(k, 1), (c,), jnp.float32)
        mean = 0.1 * jax.random.normal(jax.random.fold_in(k, 2), (c,), jnp.float32)
        var = jnp.abs(jax.random.normal(jax.random.fold_in(k, 3), (c,), jnp.float32)) + 0.5
        return (gamma, beta, mean, var)

    params = dict(
        w1=conv_w(ks[0], out_planes, in_planes, 3),
        b1=0.05 * jax.random.normal(ks[1], (out_planes,), jnp.float32),
        bn1=bn(ks[2], out_planes),
        w2=conv_w(ks[3], out_planes, out_planes, 3),
        b2=0.05 * jax.random.normal(ks[4], (out_planes,), jnp.float32),
        bn2=bn(ks[5], out_planes),
    )
    if in_planes != out_planes:
        params['ws'] = conv_w(ks[6], out_planes, in_planes, 1)
        params['bs'] = 0.05 * jax.random.normal(ks[7], (out_planes,), jnp.float32)
        params['bns'] = bn(ks[8], out_planes)
    return params


# ----------------------------------------------------------------------------
# Pure-JAX f32 reference
# ----------------------------------------------------------------------------
def ref_res3d(x, params, padding=1):
    def conv3d(inp, w, b, pad):
        y = jax.lax.conv_general_dilated(
            inp, w, window_strides=(1, 1, 1), padding=[(pad, pad)] * 3,
            dimension_numbers=('NCDHW', 'OIDHW', 'NCDHW'),
            precision=jax.lax.Precision.HIGHEST)
        return y + b.reshape(1, -1, 1, 1, 1)

    def bn(inp, p):
        g, b, m, v = p
        sh = (1, -1, 1, 1, 1)
        return (inp - m.reshape(sh)) / jnp.sqrt(v.reshape(sh) + _BN_EPS) \
            * g.reshape(sh) + b.reshape(sh)

    h = jax.nn.relu(bn(conv3d(x, params['w1'], params['b1'], padding), params['bn1']))
    res = bn(conv3d(h, params['w2'], params['b2'], padding), params['bn2'])
    if 'ws' in params:
        skip = bn(conv3d(x, params['ws'], params['bs'], 0), params['bns'])
    else:
        skip = x
    if padding == 0:
        skip = skip[:, :, 2:-2, 2:-2, 2:-2]
    return jax.nn.relu(res + skip)


if __name__ == "__main__":
    key = jax.random.PRNGKey(0)
    kx1, kp1, kx2, kp2, kx3, kp3 = jax.random.split(key, 6)

    run = jax.jit(res3d_block, static_argnames=('padding', 'tm'))

    # Test 1: in_planes != out_planes -> skip conv folded into conv2 matmul.
    N, Cin, Cout, D, H, W = 2, 4, 8, 8, 8, 8
    x1 = jax.random.normal(kx1, (N, Cin, D, H, W), jnp.float32)
    p1 = init_res3d_params(kp1, Cin, Cout)
    out1 = jax.block_until_ready(run(x1, p1, padding=1))
    assert out1.shape == (N, Cout, D, H, W), out1.shape
    ref1 = ref_res3d(x1, p1, padding=1)
    err1 = float(jnp.max(jnp.abs(out1 - ref1)))
    assert jnp.allclose(out1, ref1, atol=4e-2, rtol=4e-2), f"max_err={err1}"

    # Test 2: in_planes == out_planes -> identity skip path.
    C2 = 8
    x2 = jax.random.normal(kx2, (N, C2, D, H, W), jnp.float32)
    p2 = init_res3d_params(kp2, C2, C2)
    out2 = jax.block_until_ready(run(x2, p2, padding=1))
    assert out2.shape == (N, C2, D, H, W), out2.shape
    ref2 = ref_res3d(x2, p2, padding=1)
    err2 = float(jnp.max(jnp.abs(out2 - ref2)))
    assert jnp.allclose(out2, ref2, atol=4e-2, rtol=4e-2), f"max_err={err2}"

    # Test 3: padding=0 (valid conv, cropped identity skip).
    x3 = jax.random.normal(kx3, (1, C2, D, H, W), jnp.float32)
    p3 = init_res3d_params(kp3, C2, C2)
    out3 = jax.block_until_ready(run(x3, p3, padding=0))
    assert out3.shape == (1, C2, D - 4, H - 4, W - 4), out3.shape
    ref3 = ref_res3d(x3, p3, padding=0)
    err3 = float(jnp.max(jnp.abs(out3 - ref3)))
    assert jnp.allclose(out3, ref3, atol=4e-2, rtol=4e-2), f"max_err={err3}"

    print("KERNEL_OK")
</pallas_src>

<mosaic_0001>
module attributes {stable_mosaic.version = 11 : i64} {
  func.func @_fused_matmul_kernel(%arg0: i32, %arg1: memref<1024x128xbf16, #tpu.memory_space<vmem>>, %arg2: memref<128x128xbf16, #tpu.memory_space<vmem>>, %arg3: memref<1x128xf32, #tpu.memory_space<vmem>>, %arg4: memref<1024x128xbf16, #tpu.memory_space<vmem>>) attributes {dimension_semantics = [#tpu.dimension_semantics<parallel>], iteration_bounds = array<i64: 1>, scalar_prefetch = 0 : i64, scratch_operands = 0 : i64, tpu.core_type = #tpu.core_type<tc>, window_params = [{transform_indices = @transform_0, window_bounds = array<i64: 1024, 128>}, {pipeline_mode = #tpu.pipeline_mode<synchronous>, transform_indices = @transform_1, window_bounds = array<i64: 128, 128>}, {pipeline_mode = #tpu.pipeline_mode<synchronous>, transform_indices = @transform_2, window_bounds = array<i64: 1, 128>}, {transform_indices = @transform_3, window_bounds = array<i64: 1024, 128>}]} {
    %c0 = arith.constant 0 : index
    %c0_0 = arith.constant 0 : index
    %0 = vector.load %arg1[%c0, %c0_0] : memref<1024x128xbf16, #tpu.memory_space<vmem>>, vector<1024x128xbf16>
    %c0_1 = arith.constant 0 : index
    %c0_2 = arith.constant 0 : index
    %1 = vector.load %arg2[%c0_1, %c0_2] : memref<128x128xbf16, #tpu.memory_space<vmem>>, vector<128x128xbf16>
    %cst = arith.constant dense<0.000000e+00> : vector<1024x128xf32>
    %2 = tpu.matmul %0, %1, %cst {dimension_numbers = #tpu.dot_dimension_numbers<[1], [0], [0], [1], [0, 0, 1, 1], [], []>} : vector<1024x128xbf16>, vector<128x128xbf16>, vector<1024x128xf32> -> vector<1024x128xf32>
    %c0_3 = arith.constant 0 : index
    %c0_4 = arith.constant 0 : index
    %3 = vector.load %arg3[%c0_3, %c0_4] : memref<1x128xf32, #tpu.memory_space<vmem>>, vector<1x128xf32>
    %4 = vector.broadcast %3 : vector<1x128xf32> to vector<1024x128xf32>
    %5 = arith.addf %2, %4 : vector<1024x128xf32>
    %cst_5 = arith.constant 0.000000e+00 : f32
    %6 = vector.broadcast %cst_5 : f32 to vector<1024x128xf32>
    %7 = arith.maximumf %5, %6 : vector<1024x128xf32>
    %8 = arith.truncf %7 : vector<1024x128xf32> to vector<1024x128xbf16>
    %c0_6 = arith.constant 0 : index
    %c0_7 = arith.constant 0 : index
    %9 = vector.load %arg4[%c0_6, %c0_7] : memref<1024x128xbf16, #tpu.memory_space<vmem>>, vector<1024x128xbf16>
    tpu.vector_store %arg4[%c0_6, %c0_7], %8 {strides = array<i32>} : memref<1024x128xbf16, #tpu.memory_space<vmem>>, vector<1024x128xbf16>,
    return
  }
  func.func @transform_0(%arg0: i32) -> (i32, i32) {
    %c0_i32 = arith.constant 0 : i32
    %c0_i32_0 = arith.constant 0 : i32
    return %arg0, %c0_i32 : i32, i32
  }
  func.func @transform_1(%arg0: i32) -> (i32, i32) {
    %c0_i32 = arith.constant 0 : i32
    %c0_i32_0 = arith.constant 0 : i32
    %c0_i32_1 = arith.constant 0 : i32
    return %c0_i32, %c0_i32_0 : i32, i32
  }
  func.func @transform_2(%arg0: i32) -> (i32, i32) {
    %c0_i32 = arith.constant 0 : i32
    %c0_i32_0 = arith.constant 0 : i32
    %c0_i32_1 = arith.constant 0 : i32
    return %c0_i32, %c0_i32_0 : i32, i32
  }
  func.func @transform_3(%arg0: i32) -> (i32, i32) {
    %c0_i32 = arith.constant 0 : i32
    %c0_i32_0 = arith.constant 0 : i32
    return %arg0, %c0_i32 : i32, i32
  }
}

module attributes {stable_mosaic.version = 11 : i64} {
  func.func @_fused_matmul_kernel(%arg0: i32, %arg1: memref<1024x256xbf16, #tpu.memory_space<vmem>>, %arg2: memref<256x128xbf16, #tpu.memory_space<vmem>>, %arg3: memref<1x128xf32, #tpu.memory_space<vmem>>, %arg4: memref<1024x128xf32, #tpu.memory_space<vmem>>) attributes {dimension_semantics = [#tpu.dimension_semantics<parallel>], iteration_bounds = array<i64: 1>, scalar_prefetch = 0 : i64, scratch_operands = 0 : i64, tpu.core_type = #tpu.core_type<tc>, window_params = [{transform_indices = @transform_0, window_bounds = array<i64: 1024, 256>}, {pipeline_mode = #tpu.pipeline_mode<synchronous>, transform_indices = @transform_1, window_bounds = array<i64: 256, 128>}, {pipeline_mode = #tpu.pipeline_mode<synchronous>, transform_indices = @transform_2, window_bounds = array<i64: 1, 128>}, {transform_indices = @transform_3, window_bounds = array<i64: 1024, 128>}]} {
    %c0 = arith.constant 0 : index
    %c0_0 = arith.constant 0 : index
    %0 = vector.load %arg1[%c0, %c0_0] : memref<1024x256xbf16, #tpu.memory_space<vmem>>, vector<1024x256xbf16>
    %c0_1 = arith.constant 0 : index
    %c0_2 = arith.constant 0 : index
    %1 = vector.load %arg2[%c0_1, %c0_2] : memref<256x128xbf16, #tpu.memory_space<vmem>>, vector<256x128xbf16>
    %cst = arith.constant dense<0.000000e+00> : vector<1024x128xf32>
    %2 = tpu.matmul %0, %1, %cst {dimension_numbers = #tpu.dot_dimension_numbers<[1], [0], [0], [1], [0, 0, 1, 1], [], []>} : vector<1024x256xbf16>, vector<256x128xbf16>, vector<1024x128xf32> -> vector<1024x128xf32>
    %c0_3 = arith.constant 0 : index
    %c0_4 = arith.constant 0 : index
    %3 = vector.load %arg3[%c0_3, %c0_4] : memref<1x128xf32, #tpu.memory_space<vmem>>, vector<1x128xf32>
    %4 = vector.broadcast %3 : vector<1x128xf32> to vector<1024x128xf32>
    %5 = arith.addf %2, %4 : vector<1024x128xf32>
    %cst_5 = arith.constant 0.000000e+00 : f32
    %6 = vector.broadcast %cst_5 : f32 to vector<1024x128xf32>
    %7 = arith.maximumf %5, %6 : vector<1024x128xf32>
    %c0_6 = arith.constant 0 : index
    %c0_7 = arith.constant 0 : index
    %8 = vector.load %arg4[%c0_6, %c0_7] : memref<1024x128xf32, #tpu.memory_space<vmem>>, vector<1024x128xf32>
    tpu.vector_store %arg4[%c0_6, %c0_7], %7 {strides = array<i32>} : memref<1024x128xf32, #tpu.memory_space<vmem>>, vector<1024x128xf32>,
    return
  }
  func.func @transform_0(%arg0: i32) -> (i32, i32) {
    %c0_i32 = arith.constant 0 : i32
    %c0_i32_0 = arith.constant 0 : i32
    return %arg0, %c0_i32 : i32, i32
  }
  func.func @transform_1(%arg0: i32) -> (i32, i32) {
    %c0_i32 = arith.constant 0 : i32
    %c0_i32_0 = arith.constant 0 : i32
    %c0_i32_1 = arith.constant 0 : i32
    return %c0_i32, %c0_i32_0 : i32, i32
  }
  func.func @transform_2(%arg0: i32) -> (i32, i32) {
    %c0_i32 = arith.constant 0 : i32
    %c0_i32_0 = arith.constant 0 : i32
    %c0_i32_1 = arith.constant 0 : i32
    return %c0_i32, %c0_i32_0 : i32, i32
  }
  func.func @transform_3(%arg0: i32) -> (i32, i32) {
    %c0_i32 = arith.constant 0 : i32
    %c0_i32_0 = arith.constant 0 : i32
    return %arg0, %c0_i32 : i32, i32
  }
}

</mosaic_0001>

<bundles_post_ra>
// kernel: res3d_block.2
= control target key start
LH: loop header
LB: loop body
LE: loop exit
PB: predicated region body
PF: predicated region fallthrough
CT: control target
= control target key end

     0   :  { %s3492_s1 = inlined_call_operand.vmem [shape: bf16[128,128], index: 1, kind: input, shape index: {}]   ;;  %s3493_s0 = inlined_call_operand.vmem [shape: bf16[1024,128], index: 0, kind: input, shape index: {}]   ;;  %s3494_s2 = inlined_call_operand.vmem [shape: f32[1,128], index: 2, kind: input, shape index: {}]   ;;  %s3495_s3 = inlined_call_operand.vmem [shape: bf16[1024,128], index: 3, kind: output, shape index: {}]  }
   0x1   :  { %v2859_v0 = vld [vmem:[%s3492_s1 + $0x38] sm:$0xff]   ;;  %v2860_v1 = vld [vmem:[%s3492_s1 + $0x30] sm:$0xff]   ;;  %v2861_v2 = vld [vmem:[%s3492_s1 + $0x28] sm:$0xff]  }
   0x2   :  { %2699 = vmatprep.subr.bf16.mxu0 %v2859_v0  ;;  %2843 = vmatprep.subr.bf16.mxu1 %v2859_v0  ;;  %v2862_v3 = vld [vmem:[%s3492_s1 + $0x20] sm:$0xff]   ;;  %v2863_v6 = vld [vmem:[%s3492_s1 + $0x18] sm:$0xff]   ;;  %v2864_v7 = vld [vmem:[%s3492_s1 + $0x10] sm:$0xff]  }
   0x3   :  { %2700 = vmatpush3.bf16.msra.mxu0 %v2859_v0  ;;  %2851 = vmatpush3.bf16.msra.mxu1 %v2859_v0  ;;  %v2867_v4 = vld [vmem:[%s3493_s0] sm:$0xff]   ;;  %v2865_v8 = vld [vmem:[%s3492_s1 + $0x8] sm:$0xff]   ;;  %v2871_v12 = vld [vmem:[%s3493_s0 + $0x10] sm:$0xff]  }
   0x4   :  { %2701 = vmatprep.subr.bf16.mxu0 %v2860_v1  ;;  %2844 = vmatprep.subr.bf16.mxu1 %v2860_v1  ;;  %v2868_v5 = vld [vmem:[%s3493_s0 + $0x100] sm:$0xff]   ;;  %v2869_v10 = vld [vmem:[%s3493_s0 + $0x8] sm:$0xff]   ;;  %v2872_v13 = vld [vmem:[%s3493_s0 + $0x110] sm:$0xff]  }
   0x5   :  { %2715 = vmatprep.mubr.bf16.mxu0 %v2867_v4  ;;  %2779 = vmatprep.mubr.bf16.mxu1 %v2868_v5  ;;  %v2866_v9 = vld [vmem:[%s3492_s1] sm:$0xff]   ;;  %v2870_v11 = vld [vmem:[%s3493_s0 + $0x108] sm:$0xff]   ;;  %v2873_v14 = vld [vmem:[%s3493_s0 + $0x18] sm:$0xff]  }
   0x6   :  { %v2874_v15 = vld [vmem:[%s3493_s0 + $0x118] sm:$0xff]   ;;  %v2875_v16 = vld [vmem:[%s3493_s0 + $0x20] sm:$0xff]   ;;  %v2877_v18 = vld [vmem:[%s3493_s0 + $0x28] sm:$0xff]  }
   0x7   :  { %2702 = vmatpush3.bf16.msra.mxu0 %v2860_v1  ;;  %2852 = vmatpush3.bf16.msra.mxu1 %v2860_v1  ;;  %v2876_v17 = vld [vmem:[%s3493_s0 + $0x120] sm:$0xff]   ;;  %v2878_v19 = vld [vmem:[%s3493_s0 + $0x128] sm:$0xff]   ;;  %v2879_v20 = vld [vmem:[%s3493_s0 + $0x30] sm:$0xff]  }
   0x8   :  { %2703 = vmatprep.subr.bf16.mxu0 %v2861_v2  ;;  %2845 = vmatprep.subr.bf16.mxu1 %v2861_v2  ;;  %v2880_v21 = vld [vmem:[%s3493_s0 + $0x130] sm:$0xff]   ;;  %v2881_v22 = vld [vmem:[%s3493_s0 + $0x38] sm:$0xff]   ;;  %v2883_v24 = vld [vmem:[%s3493_s0 + $0x40] sm:$0xff]  }
   0x9   :  { %v2882_v23 = vld [vmem:[%s3493_s0 + $0x138] sm:$0xff]   ;;  %v2884_v25 = vld [vmem:[%s3493_s0 + $0x140] sm:$0xff]   ;;  %v2885_v26 = vld [vmem:[%s3493_s0 + $0x48] sm:$0xff]  }
   0xa   :  { %v2886_v27 = vld [vmem:[%s3493_s0 + $0x148] sm:$0xff]   ;;  %v2887_v28 = vld [vmem:[%s3493_s0 + $0x50] sm:$0xff]   ;;  %v2889_v30 = vld [vmem:[%s3493_s0 + $0x58] sm:$0xff]  }
   0xb   :  { %2704 = vmatpush3.bf16.msra.mxu0 %v2861_v2  ;;  %2853 = vmatpush3.bf16.msra.mxu1 %v2861_v2  ;;  %v2888_v29 = vld [vmem:[%s3493_s0 + $0x150] sm:$0xff]   ;;  %v2890_v31 = vld [vmem:[%s3493_s0 + $0x158] sm:$0xff]   ;;  %v2891_v32 = vld [vmem:[%s3493_s0 + $0x60] sm:$0xff]  }
   0xc   :  { %2705 = vmatprep.subr.bf16.mxu0 %v2862_v3  ;;  %2846 = vmatprep.subr.bf16.mxu1 %v2862_v3  ;;  %v2892_v33 = vld [vmem:[%s3493_s0 + $0x160] sm:$0xff]   ;;  %v2893_v34 = vld [vmem:[%s3493_s0 + $0x68] sm:$0xff]   ;;  %v2895_v36 = vld [vmem:[%s3493_s0 + $0x70] sm:$0xff]  }
   0xd   :  { %v2894_v35 = vld [vmem:[%s3493_s0 + $0x168] sm:$0xff]   ;;  %v2896_v37 = vld [vmem:[%s3493_s0 + $0x170] sm:$0xff]   ;;  %v2897_v38 = vld [vmem:[%s3493_s0 + $0x78] sm:$0xff]  }
   0xe   :  { %v2898_v39 = vld [vmem:[%s3493_s0 + $0x178] sm:$0xff]   ;;  %v2899_v40 = vld [vmem:[%s3493_s0 + $0x80] sm:$0xff]   ;;  %v2901_v42 = vld [vmem:[%s3493_s0 + $0x88] sm:$0xff]  }
   0xf   :  { %2706 = vmatpush3.bf16.msra.mxu0 %v2862_v3  ;;  %2854 = vmatpush3.bf16.msra.mxu1 %v2862_v3  ;;  %v2900_v41 = vld [vmem:[%s3493_s0 + $0x180] sm:$0xff]   ;;  %v2902_v43 = vld [vmem:[%s3493_s0 + $0x188] sm:$0xff]   ;;  %v2903_v44 = vld [vmem:[%s3493_s0 + $0x90] sm:$0xff]  }
  0x10   :  { %2707 = vmatprep.subr.bf16.mxu0 %v2863_v6  ;;  %2847 = vmatprep.subr.bf16.mxu1 %v2863_v6  ;;  %v2904_v45 = vld [vmem:[%s3493_s0 + $0x190] sm:$0xff]   ;;  %v2905_v46 = vld [vmem:[%s3493_s0 + $0x98] sm:$0xff]   ;;  %v2907_v48 = vld [vmem:[%s3493_s0 + $0xa0] sm:$0xff]  }
  0x11   :  { %v2906_v47 = vld [vmem:[%s3493_s0 + $0x198] sm:$0xff]   ;;  %v2908_v49 = vld [vmem:[%s3493_s0 + $0x1a0] sm:$0xff]   ;;  %v2909_v50 = vld [vmem:[%s3493_s0 + $0xa8] sm:$0xff]  }
  0x12   :  { %v2910_v51 = vld [vmem:[%s3493_s0 + $0x1a8] sm:$0xff]   ;;  %v2911_v52 = vld [vmem:[%s3493_s0 + $0xb0] sm:$0xff]   ;;  %v2913_v54 = vld [vmem:[%s3493_s0 + $0xb8] sm:$0xff]  }
  0x13   :  { %2708 = vmatpush3.bf16.msra.mxu0 %v2863_v6  ;;  %2855 = vmatpush3.bf16.msra.mxu1 %v2863_v6  ;;  %v2912_v53 = vld [vmem:[%s3493_s0 + $0x1b0] sm:$0xff]   ;;  %v2914_v55 = vld [vmem:[%s3493_s0 + $0x1b8] sm:$0xff]   ;;  %v2915_v56 = vld [vmem:[%s3493_s0 + $0xc0] sm:$0xff]  }
  0x14   :  { %2709 = vmatprep.subr.bf16.mxu0 %v2864_v7  ;;  %2848 = vmatprep.subr.bf16.mxu1 %v2864_v7  ;;  %v2916_v57 = vld [vmem:[%s3493_s0 + $0x1c0] sm:$0xff]   ;;  %v2917_v58 = vld [vmem:[%s3493_s0 + $0xc8] sm:$0xff]   ;;  %v2919_v60 = vld [vmem:[%s3493_s0 + $0xd0] sm:$0xff]  }
  0x15   :  { %v2918_v59 = vld [vmem:[%s3493_s0 + $0x1c8] sm:$0xff]   ;;  %v2920_v61 = vld [vmem:[%s3493_s0 + $0x1d0] sm:$0xff]   ;;  %v2921_v62 = vld [vmem:[%s3493_s0 + $0xd8] sm:$0xff]  }
  0x16   :  { %v2922_v63 = vld [vmem:[%s3493_s0 + $0x1d8] sm:$0xff]   ;;  %v2923_v0 = vld [vmem:[%s3493_s0 + $0xe0] sm:$0xff]   ;;  %v2925_v2 = vld [vmem:[%s3493_s0 + $0xe8] sm:$0xff]  }
  0x17   :  { %2710 = vmatpush3.bf16.msra.mxu0 %v2864_v7  ;;  %2856 = vmatpush3.bf16.msra.mxu1 %v2864_v7  ;;  %v2924_v1 = vld [vmem:[%s3493_s0 + $0x1e0] sm:$0xff]   ;;  %v2926_v3 = vld [vmem:[%s3493_s0 + $0x1e8] sm:$0xff]   ;;  %v2927_v4 = vld [vmem:[%s3493_s0 + $0xf0] sm:$0xff]  }
  0x18   :  { %2711 = vmatprep.subr.bf16.mxu0 %v2865_v8  ;;  %2849 = vmatprep.subr.bf16.mxu1 %v2865_v8  ;;  %v2928_v5 = vld [vmem:[%s3493_s0 + $0x1f0] sm:$0xff]   ;;  %v2929_v6 = vld [vmem:[%s3493_s0 + $0xf8] sm:$0xff]  }
  0x19   :  { %v2930_v7 = vld [vmem:[%s3493_s0 + $0x1f8] sm:$0xff]  }
  0x1b   :  { %2712 = vmatpush3.bf16.msra.mxu0 %v2865_v8  ;;  %2857 = vmatpush3.bf16.msra.mxu1 %v2865_v8  ;;  %v3170_v8 = vld [vmem:[%s3494_s2] ss:$0 sm:$0xff] }
  0x1c   :  { %2713 = vmatprep.subr.bf16.mxu0 %v2866_v9  ;;  %2850 = vmatprep.subr.bf16.mxu1 %v2866_v9 }
  0x1f   :  { %2714 = vmatpush3.bf16.msra.mxu0 %v2866_v9  ;;  %2858 = vmatpush3.bf16.msra.mxu1 %v2866_v9 }
  0x22   :  { %2716 = vmatmul.mubr.bf16.vlgmr.msra.gmra.mxu0 %v2869_v10  ;;  %2780 = vmatmul.mubr.bf16.vlgmr.msra.gmra.mxu1 %v2870_v11 }
  0x23   :  { %2719 = vmatprep.mubr.bf16.mxu0 %v2871_v12  ;;  %2783 = vmatprep.mubr.bf16.mxu1 %v2872_v13 }
  0x2a   :  { %2720 = vmatmul.mubr.bf16.gmra.mxu0 %v2873_v14  ;;  %2784 = vmatmul.mubr.bf16.gmra.mxu1 %v2874_v15 }
  0x2b   :  { %2723 = vmatprep.mubr.bf16.mxu0 %v2875_v16  ;;  %2787 = vmatprep.mubr.bf16.mxu1 %v2876_v17 }
  0x32   :  { %2724 = vmatmul.mubr.bf16.gmra.mxu0 %v2877_v18  ;;  %2788 = vmatmul.mubr.bf16.gmra.mxu1 %v2878_v19 }
  0x33   :  { %2727 = vmatprep.mubr.bf16.mxu0 %v2879_v20  ;;  %2791 = vmatprep.mubr.bf16.mxu1 %v2880_v21 }
  0x3a   :  { %2728 = vmatmul.mubr.bf16.gmra.mxu0 %v2881_v22  ;;  %2792 = vmatmul.mubr.bf16.gmra.mxu1 %v2882_v23 }
  0x3b   :  { %2731 = vmatprep.mubr.bf16.mxu0 %v2883_v24  ;;  %2795 = vmatprep.mubr.bf16.mxu1 %v2884_v25 }
  0x42   :  { %2732 = vmatmul.mubr.bf16.gmra.mxu0 %v2885_v26  ;;  %2796 = vmatmul.mubr.bf16.gmra.mxu1 %v2886_v27 }
  0x43   :  { %2735 = vmatprep.mubr.bf16.mxu0 %v2887_v28  ;;  %2799 = vmatprep.mubr.bf16.mxu1 %v2888_v29 }
  0x4a   :  { %2736 = vmatmul.mubr.bf16.gmra.mxu0 %v2889_v30  ;;  %2800 = vmatmul.mubr.bf16.gmra.mxu1 %v2890_v31 }
  0x4b   :  { %2739 = vmatprep.mubr.bf16.mxu0 %v2891_v32  ;;  %2803 = vmatprep.mubr.bf16.mxu1 %v2892_v33 }
  0x52   :  { %2740 = vmatmul.mubr.bf16.gmra.mxu0 %v2893_v34  ;;  %2804 = vmatmul.mubr.bf16.gmra.mxu1 %v2894_v35 }
  0x53   :  { %2743 = vmatprep.mubr.bf16.mxu0 %v2895_v36  ;;  %2807 = vmatprep.mubr.bf16.mxu1 %v2896_v37 }
  0x5a   :  { %2744 = vmatmul.mubr.bf16.gmra.mxu0 %v2897_v38  ;;  %2808 = vmatmul.mubr.bf16.gmra.mxu1 %v2898_v39 }
  0x5b   :  { %2747 = vmatprep.mubr.bf16.mxu0 %v2899_v40  ;;  %2811 = vmatprep.mubr.bf16.mxu1 %v2900_v41 }
  0x62   :  { %2748 = vmatmul.mubr.bf16.gmra.mxu0 %v2901_v42  ;;  %2812 = vmatmul.mubr.bf16.gmra.mxu1 %v2902_v43 }
  0x63   :  { %2751 = vmatprep.mubr.bf16.mxu0 %v2903_v44  ;;  %2815 = vmatprep.mubr.bf16.mxu1 %v2904_v45 }
  0x6a   :  { %2752 = vmatmul.mubr.bf16.gmra.mxu0 %v2905_v46  ;;  %2816 = vmatmul.mubr.bf16.gmra.mxu1 %v2906_v47 }
  0x6b   :  { %2755 = vmatprep.mubr.bf16.mxu0 %v2907_v48  ;;  %2819 = vmatprep.mubr.bf16.mxu1 %v2908_v49 }
  0x72   :  { %2756 = vmatmul.mubr.bf16.gmra.mxu0 %v2909_v50  ;;  %2820 = vmatmul.mubr.bf16.gmra.mxu1 %v2910_v51 }
  0x73   :  { %2759 = vmatprep.mubr.bf16.mxu0 %v2911_v52  ;;  %2823 = vmatprep.mubr.bf16.mxu1 %v2912_v53 }
  0x7a   :  { %2760 = vmatmul.mubr.bf16.gmra.mxu0 %v2913_v54  ;;  %2824 = vmatmul.mubr.bf16.gmra.mxu1 %v2914_v55 }
  0x7b   :  { %2763 = vmatprep.mubr.bf16.mxu0 %v2915_v56  ;;  %2827 = vmatprep.mubr.bf16.mxu1 %v2916_v57 }
  0x82   :  { %2764 = vmatmul.mubr.bf16.gmra.mxu0 %v2917_v58  ;;  %2828 = vmatmul.mubr.bf16.gmra.mxu1 %v2918_v59 }
  0x83   :  { %2767 = vmatprep.mubr.bf16.mxu0 %v2919_v60  ;;  %2831 = vmatprep.mubr.bf16.mxu1 %v2920_v61 }
  0x8a   :  { %2768 = vmatmul.mubr.bf16.gmra.mxu0 %v2921_v62  ;;  %2832 = vmatmul.mubr.bf16.gmra.mxu1 %v2922_v63 }
  0x8b   :  { %2771 = vmatprep.mubr.bf16.mxu0 %v2923_v0  ;;  %2835 = vmatprep.mubr.bf16.mxu1 %v2924_v1 }
  0x92   :  { %2772 = vmatmul.mubr.bf16.gmra.mxu0 %v2925_v2  ;;  %2836 = vmatmul.mubr.bf16.gmra.mxu1 %v2926_v3 }
  0x93   :  { %2775 = vmatprep.mubr.bf16.mxu0 %v2927_v4  ;;  %2839 = vmatprep.mubr.bf16.mxu1 %v2928_v5 }
  0x9a   :  { %2776 = vmatmul.mubr.bf16.gmra.mxu0 %v2929_v6  ;;  %2840 = vmatmul.mubr.bf16.gmra.mxu1 %v2930_v7 }
  0xe2   :  { %v2717_v9 = vpop.f32.mrf.mxu0  ;;  %v2781_v10 = vpop.f32.mrf.mxu1 }
  0xe3   :  { %v641_v11 = vadd.f32 %v2717_v9, %v3170_v8  ;;  %v897_v12 = vadd.f32 %v2781_v10, %v3170_v8 }
  0xe4   :  { %v632_v13 = vpop.f32.mrf.mxu0  ;;  %v888_v14 = vpop.f32.mrf.mxu1 }
  0xe5   :  { %v633_v15 = vadd.f32 %v3170_v8, %v632_v13  ;;  %v889_v16 = vadd.f32 %v3170_v8, %v888_v14  ;;  %v1145_v21 = vmax.f32 %v641_v11, 0.0  ;;  %v1209_v22 = vmax.f32 %v897_v12, 0.0 }
  0xe6   :  { %v2718_v17 = vpop.f32.mrf.mxu0  ;;  %v2782_v18 = vpop.f32.mrf.mxu1 }
  0xe7   :  { %v644_v19 = vadd.f32 %v2718_v17, %v3170_v8  ;;  %v900_v20 = vadd.f32 %v2782_v18, %v3170_v8  ;;  %v1143_v29 = vmax.f32 %v633_v15, 0.0  ;;  %v1207_v30 = vmax.f32 %v889_v16, 0.0 }
  0xe8   :  { %v635_v23 = vpop.f32.mrf.mxu0  ;;  %v891_v24 = vpop.f32.mrf.mxu1 }
  0xe9   :  { %v1146_v25 = vmax.f32 %v644_v19, 0.0  ;;  %v1210_v26 = vmax.f32 %v900_v20, 0.0  ;;  %v636_v27 = vadd.f32 %v3170_v8, %v635_v23  ;;  %v892_v28 = vadd.f32 %v3170_v8, %v891_v24 }
  0xea   :  { %v2721_v31 = vpop.f32.mrf.mxu0  ;;  %v2785_v32 = vpop.f32.mrf.mxu1 }
  0xeb   :  { %v2252_v33 = vpack.c.bf16 %v1146_v25, %v1145_v21  ;;  %v2412_v34 = vpack.c.bf16 %v1210_v26, %v1209_v22  ;;  %v1144_v35 = vmax.f32 %v636_v27, 0.0  ;;  %v1208_v36 = vmax.f32 %v892_v28, 0.0 }
  0xec   :  { %v657_v37 = vadd.f32 %v2721_v31, %v3170_v8  ;;  %v913_v38 = vadd.f32 %v2785_v32, %v3170_v8  ;;  %v648_v39 = vpop.f32.mrf.mxu0  ;;  %v904_v40 = vpop.f32.mrf.mxu1 }
  0xed   :  { %2564 = vst [vmem:[%s3495_s3 + $0x8] sm:$0xff] %v2252_v33   ;;  %2596 = vst [vmem:[%s3495_s3 + $0x108] sm:$0xff] %v2412_v34   ;;  %v2247_v41 = vpack.c.bf16 %v1144_v35, %v1143_v29  ;;  %v2407_v42 = vpack.c.bf16 %v1208_v36, %v1207_v30  ;;  %v649_v43 = vadd.f32 %v3170_v8, %v648_v39 }
  0xee   :  { %v905_v44 = vadd.f32 %v3170_v8, %v904_v40  ;;  %v2722_v45 = vpop.f32.mrf.mxu0  ;;  %v2786_v46 = vpop.f32.mrf.mxu1  ;;  %v1149_v49 = vmax.f32 %v657_v37, 0.0  ;;  %v1213_v50 = vmax.f32 %v913_v38, 0.0 }
  0xef   :  { %2248 = vst [vmem:[%s3495_s3] sm:$0xff] %v2247_v41   ;;  %2595 = vst [vmem:[%s3495_s3 + $0x100] sm:$0xff] %v2407_v42   ;;  %v660_v47 = vadd.f32 %v2722_v45, %v3170_v8  ;;  %v916_v48 = vadd.f32 %v2786_v46, %v3170_v8  ;;  %v1147_v57 = vmax.f32 %v649_v43, 0.0 }
  0xf0   :  { %v651_v51 = vpop.f32.mrf.mxu0  ;;  %v907_v52 = vpop.f32.mrf.mxu1  ;;  %v1211_v58 = vmax.f32 %v905_v44, 0.0 }
  0xf1   :  { %v1150_v53 = vmax.f32 %v660_v47, 0.0  ;;  %v1214_v54 = vmax.f32 %v916_v48, 0.0  ;;  %v652_v55 = vadd.f32 %v3170_v8, %v651_v51  ;;  %v908_v56 = vadd.f32 %v3170_v8, %v907_v52 }
  0xf2   :  { %v2725_v59 = vpop.f32.mrf.mxu0  ;;  %v2789_v60 = vpop.f32.mrf.mxu1 }
  0xf3   :  { %v2262_v61 = vpack.c.bf16 %v1150_v53, %v1149_v49  ;;  %v2422_v62 = vpack.c.bf16 %v1214_v54, %v1213_v50  ;;  %v1148_v63 = vmax.f32 %v652_v55, 0.0  ;;  %v1212_v0 = vmax.f32 %v908_v56, 0.0 }
  0xf4   :  { %v673_v1 = vadd.f32 %v2725_v59, %v3170_v8  ;;  %v929_v2 = vadd.f32 %v2789_v60, %v3170_v8  ;;  %v664_v3 = vpop.f32.mrf.mxu0  ;;  %v920_v4 = vpop.f32.mrf.mxu1 }
  0xf5   :  { %2566 = vst [vmem:[%s3495_s3 + $0x18] sm:$0xff] %v2262_v61   ;;  %2598 = vst [vmem:[%s3495_s3 + $0x118] sm:$0xff] %v2422_v62   ;;  %v2257_v5 = vpack.c.bf16 %v1148_v63, %v1147_v57  ;;  %v2417_v6 = vpack.c.bf16 %v1212_v0, %v1211_v58  ;;  %v665_v7 = vadd.f32 %v3170_v8, %v664_v3 }
  0xf6   :  { %v921_v9 = vadd.f32 %v3170_v8, %v920_v4  ;;  %v2726_v10 = vpop.f32.mrf.mxu0  ;;  %v2790_v11 = vpop.f32.mrf.mxu1  ;;  %v1153_v14 = vmax.f32 %v673_v1, 0.0  ;;  %v1217_v15 = vmax.f32 %v929_v2, 0.0 }
  0xf7   :  { %2565 = vst [vmem:[%s3495_s3 + $0x10] sm:$0xff] %v2257_v5   ;;  %2597 = vst [vmem:[%s3495_s3 + $0x110] sm:$0xff] %v2417_v6   ;;  %v676_v12 = vadd.f32 %v2726_v10, %v3170_v8  ;;  %v932_v13 = vadd.f32 %v2790_v11, %v3170_v8  ;;  %v1151_v22 = vmax.f32 %v665_v7, 0.0 }
  0xf8   :  { %v667_v16 = vpop.f32.mrf.mxu0  ;;  %v923_v17 = vpop.f32.mrf.mxu1  ;;  %v1215_v23 = vmax.f32 %v921_v9, 0.0 }
  0xf9   :  { %v1154_v18 = vmax.f32 %v676_v12, 0.0  ;;  %v1218_v19 = vmax.f32 %v932_v13, 0.0  ;;  %v668_v20 = vadd.f32 %v3170_v8, %v667_v16  ;;  %v924_v21 = vadd.f32 %v3170_v8, %v923_v17 }
  0xfa   :  { %v2729_v24 = vpop.f32.mrf.mxu0  ;;  %v2793_v25 = vpop.f32.mrf.mxu1 }
  0xfb   :  { %v2272_v26 = vpack.c.bf16 %v1154_v18, %v1153_v14  ;;  %v2432_v27 = vpack.c.bf16 %v1218_v19, %v1217_v15  ;;  %v1152_v28 = vmax.f32 %v668_v20, 0.0  ;;  %v1216_v29 = vmax.f32 %v924_v21, 0.0 }
  0xfc   :  { %v689_v30 = vadd.f32 %v2729_v24, %v3170_v8  ;;  %v945_v31 = vadd.f32 %v2793_v25, %v3170_v8  ;;  %v680_v32 = vpop.f32.mrf.mxu0  ;;  %v936_v33 = vpop.f32.mrf.mxu1 }
  0xfd   :  { %2568 = vst [vmem:[%s3495_s3 + $0x28] sm:$0xff] %v2272_v26   ;;  %2600 = vst [vmem:[%s3495_s3 + $0x128] sm:$0xff] %v2432_v27   ;;  %v2267_v34 = vpack.c.bf16 %v1152_v28, %v1151_v22  ;;  %v2427_v35 = vpack.c.bf16 %v1216_v29, %v1215_v23  ;;  %v681_v36 = vadd.f32 %v3170_v8, %v680_v32 }
  0xfe   :  { %v937_v37 = vadd.f32 %v3170_v8, %v936_v33  ;;  %v2730_v38 = vpop.f32.mrf.mxu0  ;;  %v2794_v39 = vpop.f32.mrf.mxu1  ;;  %v1157_v42 = vmax.f32 %v689_v30, 0.0  ;;  %v1221_v43 = vmax.f32 %v945_v31, 0.0 }
  0xff   :  { %2567 = vst [vmem:[%s3495_s3 + $0x20] sm:$0xff] %v2267_v34   ;;  %2599 = vst [vmem:[%s3495_s3 + $0x120] sm:$0xff] %v2427_v35   ;;  %v692_v40 = vadd.f32 %v2730_v38, %v3170_v8  ;;  %v948_v41 = vadd.f32 %v2794_v39, %v3170_v8  ;;  %v1155_v50 = vmax.f32 %v681_v36, 0.0 }
 0x100   :  { %v683_v44 = vpop.f32.mrf.mxu0  ;;  %v939_v45 = vpop.f32.mrf.mxu1  ;;  %v1219_v51 = vmax.f32 %v937_v37, 0.0 }
 0x101   :  { %v1158_v46 = vmax.f32 %v692_v40, 0.0  ;;  %v1222_v47 = vmax.f32 %v948_v41, 0.0  ;;  %v684_v48 = vadd.f32 %v3170_v8, %v683_v44  ;;  %v940_v49 = vadd.f32 %v3170_v8, %v939_v45 }
 0x102   :  { %v2733_v52 = vpop.f32.mrf.mxu0  ;;  %v2797_v53 = vpop.f32.mrf.mxu1 }
 0x103   :  { %v2282_v54 = vpack.c.bf16 %v1158_v46, %v1157_v42  ;;  %v2442_v55 = vpack.c.bf16 %v1222_v47, %v1221_v43  ;;  %v1156_v56 = vmax.f32 %v684_v48, 0.0  ;;  %v1220_v57 = vmax.f32 %v940_v49, 0.0 }
 0x104   :  { %v705_v58 = vadd.f32 %v2733_v52, %v3170_v8  ;;  %v961_v59 = vadd.f32 %v2797_v53, %v3170_v8  ;;  %v696_v60 = vpop.f32.mrf.mxu0  ;;  %v952_v61 = vpop.f32.mrf.mxu1 }
 0x105   :  { %2570 = vst [vmem:[%s3495_s3 + $0x38] sm:$0xff] %v2282_v54   ;;  %2602 = vst [vmem:[%s3495_s3 + $0x138] sm:$0xff] %v2442_v55   ;;  %v2277_v62 = vpack.c.bf16 %v1156_v56, %v1155_v50  ;;  %v2437_v63 = vpack.c.bf16 %v1220_v57, %v1219_v51  ;;  %v697_v0 = vadd.f32 %v3170_v8, %v696_v60 }
 0x106   :  { %v953_v1 = vadd.f32 %v3170_v8, %v952_v61  ;;  %v2734_v2 = vpop.f32.mrf.mxu0  ;;  %v2798_v3 = vpop.f32.mrf.mxu1  ;;  %v1161_v6 = vmax.f32 %v705_v58, 0.0  ;;  %v1225_v7 = vmax.f32 %v961_v59, 0.0 }
 0x107   :  { %2569 = vst [vmem:[%s3495_s3 + $0x30] sm:$0xff] %v2277_v62   ;;  %2601 = vst [vmem:[%s3495_s3 + $0x130] sm:$0xff] %v2437_v63   ;;  %v708_v4 = vadd.f32 %v2734_v2, %v3170_v8  ;;  %v964_v5 = vadd.f32 %v2798_v3, %v3170_v8  ;;  %v1159_v15 = vmax.f32 %v697_v0, 0.0 }
 0x108   :  { %v699_v9 = vpop.f32.mrf.mxu0  ;;  %v955_v10 = vpop.f32.mrf.mxu1  ;;  %v1223_v16 = vmax.f32 %v953_v1, 0.0 }
 0x109   :  { %v1162_v11 = vmax.f32 %v708_v4, 0.0  ;;  %v1226_v12 = vmax.f32 %v964_v5, 0.0  ;;  %v700_v13 = vadd.f32 %v3170_v8, %v699_v9  ;;  %v956_v14 = vadd.f32 %v3170_v8, %v955_v10 }
 0x10a   :  { %v2737_v17 = vpop.f32.mrf.mxu0  ;;  %v2801_v18 = vpop.f32.mrf.mxu1 }
 0x10b   :  { %v2292_v19 = vpack.c.bf16 %v1162_v11, %v1161_v6  ;;  %v2452_v20 = vpack.c.bf16 %v1226_v12, %v1225_v7  ;;  %v1160_v21 = vmax.f32 %v700_v13, 0.0  ;;  %v1224_v22 = vmax.f32 %v956_v14, 0.0 }
 0x10c   :  { %v721_v23 = vadd.f32 %v2737_v17, %v3170_v8  ;;  %v977_v24 = vadd.f32 %v2801_v18, %v3170_v8  ;;  %v712_v25 = vpop.f32.mrf.mxu0  ;;  %v968_v26 = vpop.f32.mrf.mxu1 }
 0x10d   :  { %2572 = vst [vmem:[%s3495_s3 + $0x48] sm:$0xff] %v2292_v19   ;;  %2604 = vst [vmem:[%s3495_s3 + $0x148] sm:$0xff] %v2452_v20   ;;  %v2287_v27 = vpack.c.bf16 %v1160_v21, %v1159_v15  ;;  %v2447_v28 = vpack.c.bf16 %v1224_v22, %v1223_v16  ;;  %v713_v29 = vadd.f32 %v3170_v8, %v712_v25 }
 0x10e   :  { %v969_v30 = vadd.f32 %v3170_v8, %v968_v26  ;;  %v2738_v31 = vpop.f32.mrf.mxu0  ;;  %v2802_v32 = vpop.f32.mrf.mxu1  ;;  %v1165_v35 = vmax.f32 %v721_v23, 0.0  ;;  %v1229_v36 = vmax.f32 %v977_v24, 0.0 }
 0x10f   :  { %2571 = vst [vmem:[%s3495_s3 + $0x40] sm:$0xff] %v2287_v27   ;;  %2603 = vst [vmem:[%s3495_s3 + $0x140] sm:$0xff] %v2447_v28   ;;  %v724_v33 = vadd.f32 %v2738_v31, %v3170_v8  ;;  %v980_v34 = vadd.f32 %v2802_v32, %v3170_v8  ;;  %v1163_v43 = vmax.f32 %v713_v29, 0.0 }
 0x110   :  { %v715_v37 = vpop.f32.mrf.mxu0  ;;  %v971_v38 = vpop.f32.mrf.mxu1  ;;  %v1227_v44 = vmax.f32 %v969_v30, 0.0 }
 0x111   :  { %v1166_v39 = vmax.f32 %v724_v33, 0.0  ;;  %v1230_v40 = vmax.f32 %v980_v34, 0.0  ;;  %v716_v41 = vadd.f32 %v3170_v8, %v715_v37  ;;  %v972_v42 = vadd.f32 %v3170_v8, %v971_v38 }
 0x112   :  { %v2741_v45 = vpop.f32.mrf.mxu0  ;;  %v2805_v46 = vpop.f32.mrf.mxu1 }
 0x113   :  { %v2302_v47 = vpack.c.bf16 %v1166_v39, %v1165_v35  ;;  %v2462_v48 = vpack.c.bf16 %v1230_v40, %v1229_v36  ;;  %v1164_v49 = vmax.f32 %v716_v41, 0.0  ;;  %v1228_v50 = vmax.f32 %v972_v42, 0.0 }
 0x114   :  { %v737_v51 = vadd.f32 %v2741_v45, %v3170_v8  ;;  %v993_v52 = vadd.f32 %v2805_v46, %v3170_v8  ;;  %v728_v53 = vpop.f32.mrf.mxu0  ;;  %v984_v54 = vpop.f32.mrf.mxu1 }
 0x115   :  { %2574 = vst [vmem:[%s3495_s3 + $0x58] sm:$0xff] %v2302_v47   ;;  %2606 = vst [vmem:[%s3495_s3 + $0x158] sm:$0xff] %v2462_v48   ;;  %v2297_v55 = vpack.c.bf16 %v1164_v49, %v1163_v43  ;;  %v2457_v56 = vpack.c.bf16 %v1228_v50, %v1227_v44  ;;  %v729_v57 = vadd.f32 %v3170_v8, %v728_v53 }
 0x116   :  { %v985_v58 = vadd.f32 %v3170_v8, %v984_v54  ;;  %v2742_v59 = vpop.f32.mrf.mxu0  ;;  %v2806_v60 = vpop.f32.mrf.mxu1  ;;  %v1169_v63 = vmax.f32 %v737_v51, 0.0  ;;  %v1233_v0 = vmax.f32 %v993_v52, 0.0 }
 0x117   :  { %2573 = vst [vmem:[%s3495_s3 + $0x50] sm:$0xff] %v2297_v55   ;;  %2605 = vst [vmem:[%s3495_s3 + $0x150] sm:$0xff] %v2457_v56   ;;  %v740_v61 = vadd.f32 %v2742_v59, %v3170_v8  ;;  %v996_v62 = vadd.f32 %v2806_v60, %v3170_v8  ;;  %v1167_v7 = vmax.f32 %v729_v57, 0.0 }
 0x118   :  { %v731_v1 = vpop.f32.mrf.mxu0  ;;  %v987_v2 = vpop.f32.mrf.mxu1  ;;  %v1231_v9 = vmax.f32 %v985_v58, 0.0 }
 0x119   :  { %v1170_v3 = vmax.f32 %v740_v61, 0.0  ;;  %v1234_v4 = vmax.f32 %v996_v62, 0.0  ;;  %v732_v5 = vadd.f32 %v3170_v8, %v731_v1  ;;  %v988_v6 = vadd.f32 %v3170_v8, %v987_v2 }
 0x11a   :  { %v2745_v10 = vpop.f32.mrf.mxu0  ;;  %v2809_v11 = vpop.f32.mrf.mxu1 }
 0x11b   :  { %v2312_v12 = vpack.c.bf16 %v1170_v3, %v1169_v63  ;;  %v2472_v13 = vpack.c.bf16 %v1234_v4, %v1233_v0  ;;  %v1168_v14 = vmax.f32 %v732_v5, 0.0  ;;  %v1232_v15 = vmax.f32 %v988_v6, 0.0 }
 0x11c   :  { %v753_v16 = vadd.f32 %v2745_v10, %v3170_v8  ;;  %v1009_v17 = vadd.f32 %v2809_v11, %v3170_v8  ;;  %v744_v18 = vpop.f32.mrf.mxu0  ;;  %v1000_v19 = vpop.f32.mrf.mxu1 }
 0x11d   :  { %2576 = vst [vmem:[%s3495_s3 + $0x68] sm:$0xff] %v2312_v12   ;;  %2608 = vst [vmem:[%s3495_s3 + $0x168] sm:$0xff] %v2472_v13   ;;  %v2307_v20 = vpack.c.bf16 %v1168_v14, %v1167_v7  ;;  %v2467_v21 = vpack.c.bf16 %v1232_v15, %v1231_v9  ;;  %v745_v22 = vadd.f32 %v3170_v8, %v744_v18 }
 0x11e   :  { %v1001_v23 = vadd.f32 %v3170_v8, %v1000_v19  ;;  %v2746_v24 = vpop.f32.mrf.mxu0  ;;  %v2810_v25 = vpop.f32.mrf.mxu1  ;;  %v1173_v28 = vmax.f32 %v753_v16, 0.0  ;;  %v1237_v29 = vmax.f32 %v1009_v17, 0.0 }
 0x11f   :  { %2575 = vst [vmem:[%s3495_s3 + $0x60] sm:$0xff] %v2307_v20   ;;  %2607 = vst [vmem:[%s3495_s3 + $0x160] sm:$0xff] %v2467_v21   ;;  %v756_v26 = vadd.f32 %v2746_v24, %v3170_v8  ;;  %v1012_v27 = vadd.f32 %v2810_v25, %v3170_v8  ;;  %v1171_v36 = vmax.f32 %v745_v22, 0.0 }
 0x120   :  { %v747_v30 = vpop.f32.mrf.mxu0  ;;  %v1003_v31 = vpop.f32.mrf.mxu1  ;;  %v1235_v37 = vmax.f32 %v1001_v23, 0.0 }
 0x121   :  { %v1174_v32 = vmax.f32 %v756_v26, 0.0  ;;  %v1238_v33 = vmax.f32 %v1012_v27, 0.0  ;;  %v748_v34 = vadd.f32 %v3170_v8, %v747_v30  ;;  %v1004_v35 = vadd.f32 %v3170_v8, %v1003_v31 }
 0x122   :  { %v2749_v38 = vpop.f32.mrf.mxu0  ;;  %v2813_v39 = vpop.f32.mrf.mxu1 }
 0x123   :  { %v2322_v40 = vpack.c.bf16 %v1174_v32, %v1173_v28  ;;  %v2482_v41 = vpack.c.bf16 %v1238_v33, %v1237_v29  ;;  %v1172_v42 = vmax.f32 %v748_v34, 0.0  ;;  %v1236_v43 = vmax.f32 %v1004_v35, 0.0 }
 0x124   :  { %v769_v44 = vadd.f32 %v2749_v38, %v3170_v8  ;;  %v1025_v45 = vadd.f32 %v2813_v39, %v3170_v8  ;;  %v760_v46 = vpop.f32.mrf.mxu0  ;;  %v1016_v47 = vpop.f32.mrf.mxu1 }
 0x125   :  { %2578 = vst [vmem:[%s3495_s3 + $0x78] sm:$0xff] %v2322_v40   ;;  %2610 = vst [vmem:[%s3495_s3 + $0x178] sm:$0xff] %v2482_v41   ;;  %v2317_v48 = vpack.c.bf16 %v1172_v42, %v1171_v36  ;;  %v2477_v49 = vpack.c.bf16 %v1236_v43, %v1235_v37  ;;  %v761_v50 = vadd.f32 %v3170_v8, %v760_v46 }
 0x126   :  { %v1017_v51 = vadd.f32 %v3170_v8, %v1016_v47  ;;  %v2750_v52 = vpop.f32.mrf.mxu0  ;;  %v2814_v53 = vpop.f32.mrf.mxu1  ;;  %v1177_v56 = vmax.f32 %v769_v44, 0.0  ;;  %v1241_v57 = vmax.f32 %v1025_v45, 0.0 }
 0x127   :  { %2577 = vst [vmem:[%s3495_s3 + $0x70] sm:$0xff] %v2317_v48   ;;  %2609 = vst [vmem:[%s3495_s3 + $0x170] sm:$0xff] %v2477_v49   ;;  %v772_v54 = vadd.f32 %v2750_v52, %v3170_v8  ;;  %v1028_v55 = vadd.f32 %v2814_v53, %v3170_v8  ;;  %v1175_v0 = vmax.f32 %v761_v50, 0.0 }
 0x128   :  { %v763_v58 = vpop.f32.mrf.mxu0  ;;  %v1019_v59 = vpop.f32.mrf.mxu1  ;;  %v1239_v1 = vmax.f32 %v1017_v51, 0.0 }
 0x129   :  { %v1178_v60 = vmax.f32 %v772_v54, 0.0  ;;  %v1242_v61 = vmax.f32 %v1028_v55, 0.0  ;;  %v764_v62 = vadd.f32 %v3170_v8, %v763_v58  ;;  %v1020_v63 = vadd.f32 %v3170_v8, %v1019_v59 }
 0x12a   :  { %v2753_v2 = vpop.f32.mrf.mxu0  ;;  %v2817_v3 = vpop.f32.mrf.mxu1 }
 0x12b   :  { %v2332_v4 = vpack.c.bf16 %v1178_v60, %v1177_v56  ;;  %v2492_v5 = vpack.c.bf16 %v1242_v61, %v1241_v57  ;;  %v1176_v6 = vmax.f32 %v764_v62, 0.0  ;;  %v1240_v7 = vmax.f32 %v1020_v63, 0.0 }
 0x12c   :  { %v785_v9 = vadd.f32 %v2753_v2, %v3170_v8  ;;  %v1041_v10 = vadd.f32 %v2817_v3, %v3170_v8  ;;  %v776_v11 = vpop.f32.mrf.mxu0  ;;  %v1032_v12 = vpop.f32.mrf.mxu1 }
 0x12d   :  { %2580 = vst [vmem:[%s3495_s3 + $0x88] sm:$0xff] %v2332_v4   ;;  %2612 = vst [vmem:[%s3495_s3 + $0x188] sm:$0xff] %v2492_v5   ;;  %v2327_v13 = vpack.c.bf16 %v1176_v6, %v1175_v0  ;;  %v2487_v14 = vpack.c.bf16 %v1240_v7, %v1239_v1  ;;  %v777_v15 = vadd.f32 %v3170_v8, %v776_v11 }
 0x12e   :  { %v1033_v16 = vadd.f32 %v3170_v8, %v1032_v12  ;;  %v2754_v17 = vpop.f32.mrf.mxu0  ;;  %v2818_v18 = vpop.f32.mrf.mxu1  ;;  %v1181_v21 = vmax.f32 %v785_v9, 0.0  ;;  %v1245_v22 = vmax.f32 %v1041_v10, 0.0 }
 0x12f   :  { %2579 = vst [vmem:[%s3495_s3 + $0x80] sm:$0xff] %v2327_v13   ;;  %2611 = vst [vmem:[%s3495_s3 + $0x180] sm:$0xff] %v2487_v14   ;;  %v788_v19 = vadd.f32 %v2754_v17, %v3170_v8  ;;  %v1044_v20 = vadd.f32 %v2818_v18, %v3170_v8  ;;  %v1179_v29 = vmax.f32 %v777_v15, 0.0 }
 0x130   :  { %v779_v23 = vpop.f32.mrf.mxu0  ;;  %v1035_v24 = vpop.f32.mrf.mxu1  ;;  %v1243_v30 = vmax.f32 %v1033_v16, 0.0 }
 0x131   :  { %v1182_v25 = vmax.f32 %v788_v19, 0.0  ;;  %v1246_v26 = vmax.f32 %v1044_v20, 0.0  ;;  %v780_v27 = vadd.f32 %v3170_v8, %v779_v23  ;;  %v1036_v28 = vadd.f32 %v3170_v8, %v1035_v24 }
 0x132   :  { %v2757_v31 = vpop.f32.mrf.mxu0  ;;  %v2821_v32 = vpop.f32.mrf.mxu1 }
 0x133   :  { %v2342_v33 = vpack.c.bf16 %v1182_v25, %v1181_v21  ;;  %v2502_v34 = vpack.c.bf16 %v1246_v26, %v1245_v22  ;;  %v1180_v35 = vmax.f32 %v780_v27, 0.0  ;;  %v1244_v36 = vmax.f32 %v1036_v28, 0.0 }
 0x134   :  { %v801_v37 = vadd.f32 %v2757_v31, %v3170_v8  ;;  %v1057_v38 = vadd.f32 %v2821_v32, %v3170_v8  ;;  %v792_v39 = vpop.f32.mrf.mxu0  ;;  %v1048_v40 = vpop.f32.mrf.mxu1 }
 0x135   :  { %2582 = vst [vmem:[%s3495_s3 + $0x98] sm:$0xff] %v2342_v33   ;;  %2614 = vst [vmem:[%s3495_s3 + $0x198] sm:$0xff] %v2502_v34   ;;  %v2337_v41 = vpack.c.bf16 %v1180_v35, %v1179_v29  ;;  %v2497_v42 = vpack.c.bf16 %v1244_v36, %v1243_v30  ;;  %v793_v43 = vadd.f32 %v3170_v8, %v792_v39 }
 0x136   :  { %v1049_v44 = vadd.f32 %v3170_v8, %v1048_v40  ;;  %v2758_v45 = vpop.f32.mrf.mxu0  ;;  %v2822_v46 = vpop.f32.mrf.mxu1  ;;  %v1185_v49 = vmax.f32 %v801_v37, 0.0  ;;  %v1249_v50 = vmax.f32 %v1057_v38, 0.0 }
 0x137   :  { %2581 = vst [vmem:[%s3495_s3 + $0x90] sm:$0xff] %v2337_v41   ;;  %2613 = vst [vmem:[%s3495_s3 + $0x190] sm:$0xff] %v2497_v42   ;;  %v804_v47 = vadd.f32 %v2758_v45, %v3170_v8  ;;  %v1060_v48 = vadd.f32 %v2822_v46, %v3170_v8  ;;  %v1183_v57 = vmax.f32 %v793_v43, 0.0 }
 0x138   :  { %v795_v51 = vpop.f32.mrf.mxu0  ;;  %v1051_v52 = vpop.f32.mrf.mxu1  ;;  %v1247_v58 = vmax.f32 %v1049_v44, 0.0 }
 0x139   :  { %v1186_v53 = vmax.f32 %v804_v47, 0.0  ;;  %v1250_v54 = vmax.f32 %v1060_v48, 0.0  ;;  %v796_v55 = vadd.f32 %v3170_v8, %v795_v51  ;;  %v1052_v56 = vadd.f32 %v3170_v8, %v1051_v52 }
 0x13a   :  { %v2761_v59 = vpop.f32.mrf.mxu0  ;;  %v2825_v60 = vpop.f32.mrf.mxu1 }
 0x13b   :  { %v2352_v61 = vpack.c.bf16 %v1186_v53, %v1185_v49  ;;  %v2512_v62 = vpack.c.bf16 %v1250_v54, %v1249_v50  ;;  %v1184_v63 = vmax.f32 %v796_v55, 0.0  ;;  %v1248_v0 = vmax.f32 %v1052_v56, 0.0 }
 0x13c   :  { %v817_v1 = vadd.f32 %v2761_v59, %v3170_v8  ;;  %v1073_v2 = vadd.f32 %v2825_v60, %v3170_v8  ;;  %v808_v3 = vpop.f32.mrf.mxu0  ;;  %v1064_v4 = vpop.f32.mrf.mxu1 }
 0x13d   :  { %2584 = vst [vmem:[%s3495_s3 + $0xa8] sm:$0xff] %v2352_v61   ;;  %2616 = vst [vmem:[%s3495_s3 + $0x1a8] sm:$0xff] %v2512_v62   ;;  %v2347_v5 = vpack.c.bf16 %v1184_v63, %v1183_v57  ;;  %v2507_v6 = vpack.c.bf16 %v1248_v0, %v1247_v58  ;;  %v809_v7 = vadd.f32 %v3170_v8, %v808_v3 }
 0x13e   :  { %v1065_v9 = vadd.f32 %v3170_v8, %v1064_v4  ;;  %v2762_v10 = vpop.f32.mrf.mxu0  ;;  %v2826_v11 = vpop.f32.mrf.mxu1  ;;  %v1189_v14 = vmax.f32 %v817_v1, 0.0  ;;  %v1253_v15 = vmax.f32 %v1073_v2, 0.0 }
 0x13f   :  { %2583 = vst [vmem:[%s3495_s3 + $0xa0] sm:$0xff] %v2347_v5   ;;  %2615 = vst [vmem:[%s3495_s3 + $0x1a0] sm:$0xff] %v2507_v6   ;;  %v820_v12 = vadd.f32 %v2762_v10, %v3170_v8  ;;  %v1076_v13 = vadd.f32 %v2826_v11, %v3170_v8  ;;  %v1187_v22 = vmax.f32 %v809_v7, 0.0 }
 0x140   :  { %v811_v16 = vpop.f32.mrf.mxu0  ;;  %v1067_v17 = vpop.f32.mrf.mxu1  ;;  %v1251_v23 = vmax.f32 %v1065_v9, 0.0 }
 0x141   :  { %v1190_v18 = vmax.f32 %v820_v12, 0.0  ;;  %v1254_v19 = vmax.f32 %v1076_v13, 0.0  ;;  %v812_v20 = vadd.f32 %v3170_v8, %v811_v16  ;;  %v1068_v21 = vadd.f32 %v3170_v8, %v1067_v17 }
 0x142   :  { %v2765_v24 = vpop.f32.mrf.mxu0  ;;  %v2829_v25 = vpop.f32.mrf.mxu1 }
 0x143   :  { %v2362_v26 = vpack.c.bf16 %v1190_v18, %v1189_v14  ;;  %v2522_v27 = vpack.c.bf16 %v1254_v19, %v1253_v15  ;;  %v1188_v28 = vmax.f32 %v812_v20, 0.0  ;;  %v1252_v29 = vmax.f32 %v1068_v21, 0.0 }
 0x144   :  { %v833_v30 = vadd.f32 %v2765_v24, %v3170_v8  ;;  %v1089_v31 = vadd.f32 %v2829_v25, %v3170_v8  ;;  %v824_v32 = vpop.f32.mrf.mxu0  ;;  %v1080_v33 = vpop.f32.mrf.mxu1 }
 0x145   :  { %2586 = vst [vmem:[%s3495_s3 + $0xb8] sm:$0xff] %v2362_v26   ;;  %2618 = vst [vmem:[%s3495_s3 + $0x1b8] sm:$0xff] %v2522_v27   ;;  %v2357_v34 = vpack.c.bf16 %v1188_v28, %v1187_v22  ;;  %v2517_v35 = vpack.c.bf16 %v1252_v29, %v1251_v23  ;;  %v825_v36 = vadd.f32 %v3170_v8, %v824_v32 }
 0x146   :  { %v1081_v37 = vadd.f32 %v3170_v8, %v1080_v33  ;;  %v2766_v38 = vpop.f32.mrf.mxu0  ;;  %v2830_v39 = vpop.f32.mrf.mxu1  ;;  %v1193_v42 = vmax.f32 %v833_v30, 0.0  ;;  %v1257_v43 = vmax.f32 %v1089_v31, 0.0 }
 0x147   :  { %2585 = vst [vmem:[%s3495_s3 + $0xb0] sm:$0xff] %v2357_v34   ;;  %2617 = vst [vmem:[%s3495_s3 + $0x1b0] sm:$0xff] %v2517_v35   ;;  %v836_v40 = vadd.f32 %v2766_v38, %v3170_v8  ;;  %v1092_v41 = vadd.f32 %v2830_v39, %v3170_v8  ;;  %v1191_v50 = vmax.f32 %v825_v36, 0.0 }
 0x148   :  { %v827_v44 = vpop.f32.mrf.mxu0  ;;  %v1083_v45 = vpop.f32.mrf.mxu1  ;;  %v1255_v51 = vmax.f32 %v1081_v37, 0.0 }
 0x149   :  { %v1194_v46 = vmax.f32 %v836_v40, 0.0  ;;  %v1258_v47 = vmax.f32 %v1092_v41, 0.0  ;;  %v828_v48 = vadd.f32 %v3170_v8, %v827_v44  ;;  %v1084_v49 = vadd.f32 %v3170_v8, %v1083_v45 }
 0x14a   :  { %v2769_v52 = vpop.f32.mrf.mxu0  ;;  %v2833_v53 = vpop.f32.mrf.mxu1 }
 0x14b   :  { %v2372_v54 = vpack.c.bf16 %v1194_v46, %v1193_v42  ;;  %v2532_v55 = vpack.c.bf16 %v1258_v47, %v1257_v43  ;;  %v1192_v56 = vmax.f32 %v828_v48, 0.0  ;;  %v1256_v57 = vmax.f32 %v1084_v49, 0.0 }
 0x14c   :  { %v849_v58 = vadd.f32 %v2769_v52, %v3170_v8  ;;  %v1105_v59 = vadd.f32 %v2833_v53, %v3170_v8  ;;  %v840_v60 = vpop.f32.mrf.mxu0  ;;  %v1096_v61 = vpop.f32.mrf.mxu1 }
 0x14d   :  { %2588 = vst [vmem:[%s3495_s3 + $0xc8] sm:$0xff] %v2372_v54   ;;  %2620 = vst [vmem:[%s3495_s3 + $0x1c8] sm:$0xff] %v2532_v55   ;;  %v2367_v62 = vpack.c.bf16 %v1192_v56, %v1191_v50  ;;  %v2527_v63 = vpack.c.bf16 %v1256_v57, %v1255_v51  ;;  %v841_v0 = vadd.f32 %v3170_v8, %v840_v60 }
 0x14e   :  { %v1097_v1 = vadd.f32 %v3170_v8, %v1096_v61  ;;  %v2770_v2 = vpop.f32.mrf.mxu0  ;;  %v2834_v3 = vpop.f32.mrf.mxu1  ;;  %v1197_v6 = vmax.f32 %v849_v58, 0.0  ;;  %v1261_v7 = vmax.f32 %v1105_v59, 0.0 }
 0x14f   :  { %2587 = vst [vmem:[%s3495_s3 + $0xc0] sm:$0xff] %v2367_v62   ;;  %2619 = vst [vmem:[%s3495_s3 + $0x1c0] sm:$0xff] %v2527_v63   ;;  %v852_v4 = vadd.f32 %v2770_v2, %v3170_v8  ;;  %v1108_v5 = vadd.f32 %v2834_v3, %v3170_v8  ;;  %v1195_v15 = vmax.f32 %v841_v0, 0.0 }
 0x150   :  { %v843_v9 = vpop.f32.mrf.mxu0  ;;  %v1099_v10 = vpop.f32.mrf.mxu1  ;;  %v1259_v16 = vmax.f32 %v1097_v1, 0.0 }
 0x151   :  { %v1198_v11 = vmax.f32 %v852_v4, 0.0  ;;  %v1262_v12 = vmax.f32 %v1108_v5, 0.0  ;;  %v844_v13 = vadd.f32 %v3170_v8, %v843_v9  ;;  %v1100_v14 = vadd.f32 %v3170_v8, %v1099_v10 }
 0x152   :  { %v2773_v17 = vpop.f32.mrf.mxu0  ;;  %v2837_v18 = vpop.f32.mrf.mxu1 }
 0x153   :  { %v2382_v19 = vpack.c.bf16 %v1198_v11, %v1197_v6  ;;  %v2542_v20 = vpack.c.bf16 %v1262_v12, %v1261_v7  ;;  %v1196_v21 = vmax.f32 %v844_v13, 0.0  ;;  %v1260_v22 = vmax.f32 %v1100_v14, 0.0 }
 0x154   :  { %v865_v23 = vadd.f32 %v2773_v17, %v3170_v8  ;;  %v1121_v24 = vadd.f32 %v2837_v18, %v3170_v8  ;;  %v856_v25 = vpop.f32.mrf.mxu0  ;;  %v1112_v26 = vpop.f32.mrf.mxu1 }
 0x155   :  { %2590 = vst [vmem:[%s3495_s3 + $0xd8] sm:$0xff] %v2382_v19   ;;  %2622 = vst [vmem:[%s3495_s3 + $0x1d8] sm:$0xff] %v2542_v20   ;;  %v2377_v27 = vpack.c.bf16 %v1196_v21, %v1195_v15  ;;  %v2537_v28 = vpack.c.bf16 %v1260_v22, %v1259_v16  ;;  %v857_v29 = vadd.f32 %v3170_v8, %v856_v25 }
 0x156   :  { %v1113_v30 = vadd.f32 %v3170_v8, %v1112_v26  ;;  %v2774_v31 = vpop.f32.mrf.mxu0  ;;  %v2838_v32 = vpop.f32.mrf.mxu1  ;;  %v1201_v35 = vmax.f32 %v865_v23, 0.0  ;;  %v1265_v36 = vmax.f32 %v1121_v24, 0.0 }
 0x157   :  { %2589 = vst [vmem:[%s3495_s3 + $0xd0] sm:$0xff] %v2377_v27   ;;  %2621 = vst [vmem:[%s3495_s3 + $0x1d0] sm:$0xff] %v2537_v28   ;;  %v868_v33 = vadd.f32 %v2774_v31, %v3170_v8  ;;  %v1124_v34 = vadd.f32 %v2838_v32, %v3170_v8  ;;  %v1199_v43 = vmax.f32 %v857_v29, 0.0 }
 0x158   :  { %v859_v37 = vpop.f32.mrf.mxu0  ;;  %v1115_v38 = vpop.f32.mrf.mxu1  ;;  %v1263_v44 = vmax.f32 %v1113_v30, 0.0 }
 0x159   :  { %v1202_v39 = vmax.f32 %v868_v33, 0.0  ;;  %v1266_v40 = vmax.f32 %v1124_v34, 0.0  ;;  %v860_v41 = vadd.f32 %v3170_v8, %v859_v37  ;;  %v1116_v42 = vadd.f32 %v3170_v8, %v1115_v38 }
 0x15a   :  { %v2777_v45 = vpop.f32.mrf.mxu0  ;;  %v2841_v46 = vpop.f32.mrf.mxu1 }
 0x15b   :  { %v2392_v47 = vpack.c.bf16 %v1202_v39, %v1201_v35  ;;  %v2552_v48 = vpack.c.bf16 %v1266_v40, %v1265_v36  ;;  %v1200_v49 = vmax.f32 %v860_v41, 0.0  ;;  %v1264_v50 = vmax.f32 %v1116_v42, 0.0 }
 0x15c   :  { %v881_v51 = vadd.f32 %v2777_v45, %v3170_v8  ;;  %v1137_v52 = vadd.f32 %v2841_v46, %v3170_v8  ;;  %v872_v53 = vpop.f32.mrf.mxu0  ;;  %v1128_v54 = vpop.f32.mrf.mxu1 }
 0x15d   :  { %2592 = vst [vmem:[%s3495_s3 + $0xe8] sm:$0xff] %v2392_v47   ;;  %2624 = vst [vmem:[%s3495_s3 + $0x1e8] sm:$0xff] %v2552_v48   ;;  %v2387_v55 = vpack.c.bf16 %v1200_v49, %v1199_v43  ;;  %v2547_v56 = vpack.c.bf16 %v1264_v50, %v1263_v44  ;;  %v873_v57 = vadd.f32 %v3170_v8, %v872_v53 }
 0x15e   :  { %v1129_v58 = vadd.f32 %v3170_v8, %v1128_v54  ;;  %v2778_v59 = vpop.f32.mrf.mxu0  ;;  %v2842_v60 = vpop.f32.mrf.mxu1  ;;  %v1205_v63 = vmax.f32 %v881_v51, 0.0  ;;  %v1269_v0 = vmax.f32 %v1137_v52, 0.0 }
 0x15f   :  { %2591 = vst [vmem:[%s3495_s3 + $0xe0] sm:$0xff] %v2387_v55   ;;  %2623 = vst [vmem:[%s3495_s3 + $0x1e0] sm:$0xff] %v2547_v56   ;;  %v884_v61 = vadd.f32 %v2778_v59, %v3170_v8  ;;  %v1140_v62 = vadd.f32 %v2842_v60, %v3170_v8  ;;  %v1203_v7 = vmax.f32 %v873_v57, 0.0 }
 0x160   :  { %v875_v1 = vpop.f32.mrf.mxu0  ;;  %v1131_v2 = vpop.f32.mrf.mxu1  ;;  %v1267_v9 = vmax.f32 %v1129_v58, 0.0 }
 0x161   :  { %v1206_v3 = vmax.f32 %v884_v61, 0.0  ;;  %v1270_v4 = vmax.f32 %v1140_v62, 0.0  ;;  %v876_v5 = vadd.f32 %v3170_v8, %v875_v1  ;;  %v1132_v6 = vadd.f32 %v3170_v8, %v1131_v2 }
 0x163   :  { %v2402_v10 = vpack.c.bf16 %v1206_v3, %v1205_v63  ;;  %v2562_v11 = vpack.c.bf16 %v1270_v4, %v1269_v0  ;;  %v1204_v12 = vmax.f32 %v876_v5, 0.0  ;;  %v1268_v13 = vmax.f32 %v1132_v6, 0.0 }
 0x165   :  { %2594 = vst [vmem:[%s3495_s3 + $0xf8] sm:$0xff] %v2402_v10   ;;  %2626 = vst [vmem:[%s3495_s3 + $0x1f8] sm:$0xff] %v2562_v11   ;;  %v2397_v14 = vpack.c.bf16 %v1204_v12, %v1203_v7  ;;  %v2557_v15 = vpack.c.bf16 %v1268_v13, %v1267_v9 }
 0x167   :  { %2593 = vst [vmem:[%s3495_s3 + $0xf0] sm:$0xff] %v2397_v14   ;;  %2625 = vst [vmem:[%s3495_s3 + $0x1f0] sm:$0xff] %v2557_v15  }

// kernel: res3d_block.3
= control target key start
LH: loop header
LB: loop body
LE: loop exit
PB: predicated region body
PF: predicated region fallthrough
CT: control target
= control target key end

     0   :  { %v2110_v0 = vmov 0   ;;  %s3117_s1 = inlined_call_operand.vmem [shape: bf16[256,128], index: 1, kind: input, shape index: {}]   ;;  %s3118_s0 = inlined_call_operand.vmem [shape: bf16[1024,256], index: 0, kind: input, shape index: {}]   ;;  %s3119_s2 = inlined_call_operand.vmem [shape: f32[1,128], index: 2, kind: input, shape index: {}]   ;;  %s3120_s3 = inlined_call_operand.vmem [shape: f32[1024,128], index: 3, kind: output, shape index: {}]  }
   0x1   :  { %918 = vmatprep.subr.bf16.mxu0 %v2110_v0  ;;  %1868 = vmatprep.subr.bf16.mxu1 %v2110_v0  ;;  %v1901_v1 = vld [vmem:[%s3117_s1 + $0x38] sm:$0xff]   ;;  %v1902_v2 = vld [vmem:[%s3117_s1 + $0x30] sm:$0xff]   ;;  %v1903_v3 = vld [vmem:[%s3117_s1 + $0x28] sm:$0xff]  }
   0x2   :  { %919 = vmatpush1.bf16.msra.mxu0 %v1901_v1  ;;  %1884 = vmatpush1.bf16.msra.mxu1 %v1901_v1  ;;  %v1904_v4 = vld [vmem:[%s3117_s1 + $0x20] sm:$0xff]   ;;  %v1905_v5 = vld [vmem:[%s3117_s1 + $0x18] sm:$0xff]   ;;  %v1906_v7 = vld [vmem:[%s3117_s1 + $0x10] sm:$0xff]  }
   0x3   :  { %920 = vmatprep.subr.bf16.mxu0 %v2110_v0  ;;  %1869 = vmatprep.subr.bf16.mxu1 %v2110_v0  ;;  %v1919_v6 = vld [vmem:[%s3118_s0 + $0x4] ss:$8 sps:$4 sm:$0xff]   ;;  %v1909_v11 = vld [vmem:[%s3117_s1 + $0x78] sm:$0xff]   ;;  %v1910_v12 = vld [vmem:[%s3117_s1 + $0x70] sm:$0xff]  }
   0x4   :  { %v1922_v8 = vld [vmem:[%s3118_s0 + $0x204] ss:$8 sps:$4 sm:$0xff]   ;;  %950 = vmatprep.mubr.bf16.mxu0 %v1919_v6  ;;  %v1913_v15 = vld [vmem:[%s3117_s1 + $0x58] sm:$0xff]   ;;  %v1914_v16 = vld [vmem:[%s3117_s1 + $0x50] sm:$0xff]  }
   0x5   :  { %1206 = vmatprep.mubr.bf16.mxu1 %v1922_v8  ;;  %v1907_v9 = vld [vmem:[%s3117_s1 + $0x8] sm:$0xff]   ;;  %v1908_v10 = vld [vmem:[%s3117_s1] sm:$0xff]   ;;  %v1923_v21 = vld [vmem:[%s3118_s0 + $0x14] ss:$8 sps:$4 sm:$0xff]  }
   0x6   :  { %921 = vmatpush1.bf16.msra.mxu0 %v1902_v2  ;;  %1885 = vmatpush1.bf16.msra.mxu1 %v1902_v2  ;;  %v1911_v13 = vld [vmem:[%s3117_s1 + $0x68] sm:$0xff]   ;;  %v1912_v14 = vld [vmem:[%s3117_s1 + $0x60] sm:$0xff]   ;;  %v1925_v22 = vld [vmem:[%s3118_s0 + $0x214] ss:$8 sps:$4 sm:$0xff]  }
   0x7   :  { %922 = vmatprep.subr.bf16.mxu0 %v2110_v0  ;;  %1870 = vmatprep.subr.bf16.mxu1 %v2110_v0  ;;  %v1915_v17 = vld [vmem:[%s3117_s1 + $0x48] sm:$0xff]   ;;  %v1916_v18 = vld [vmem:[%s3117_s1 + $0x40] sm:$0xff]   ;;  %v1927_v23 = vld [vmem:[%s3118_s0 + $0x10] ss:$8 sps:$4 sm:$0xff]  }
   0x8   :  { %v1917_v19 = vld [vmem:[%s3118_s0] ss:$8 sps:$4 sm:$0xff]   ;;  %v1928_v24 = vld [vmem:[%s3118_s0 + $0x210] ss:$8 sps:$4 sm:$0xff]   ;;  %v1929_v25 = vld [vmem:[%s3118_s0 + $0x24] ss:$8 sps:$4 sm:$0xff]  }
   0x9   :  { %v1920_v20 = vld [vmem:[%s3118_s0 + $0x200] ss:$8 sps:$4 sm:$0xff]   ;;  %v1931_v26 = vld [vmem:[%s3118_s0 + $0x224] ss:$8 sps:$4 sm:$0xff]   ;;  %v1935_v29 = vld [vmem:[%s3118_s0 + $0x34] ss:$8 sps:$4 sm:$0xff]  }
   0xa   :  { %923 = vmatpush1.bf16.msra.mxu0 %v1903_v3  ;;  %1886 = vmatpush1.bf16.msra.mxu1 %v1903_v3  ;;  %v1933_v27 = vld [vmem:[%s3118_s0 + $0x20] ss:$8 sps:$4 sm:$0xff]   ;;  %v1937_v30 = vld [vmem:[%s3118_s0 + $0x234] ss:$8 sps:$4 sm:$0xff]   ;;  %v1939_v31 = vld [vmem:[%s3118_s0 + $0x30] ss:$8 sps:$4 sm:$0xff]  }
   0xb   :  { %924 = vmatprep.subr.bf16.mxu0 %v2110_v0  ;;  %1871 = vmatprep.subr.bf16.mxu1 %v2110_v0  ;;  %v1934_v28 = vld [vmem:[%s3118_s0 + $0x220] ss:$8 sps:$4 sm:$0xff]   ;;  %v1940_v32 = vld [vmem:[%s3118_s0 + $0x230] ss:$8 sps:$4 sm:$0xff]   ;;  %v1941_v33 = vld [vmem:[%s3118_s0 + $0x44] ss:$8 sps:$4 sm:$0xff]  }
   0xc   :  { %v1943_v34 = vld [vmem:[%s3118_s0 + $0x244] ss:$8 sps:$4 sm:$0xff]   ;;  %v1945_v35 = vld [vmem:[%s3118_s0 + $0x40] ss:$8 sps:$4 sm:$0xff]   ;;  %v1947_v37 = vld [vmem:[%s3118_s0 + $0x54] ss:$8 sps:$4 sm:$0xff]  }
   0xd   :  { %v1946_v36 = vld [vmem:[%s3118_s0 + $0x240] ss:$8 sps:$4 sm:$0xff]   ;;  %v1949_v38 = vld [vmem:[%s3118_s0 + $0x254] ss:$8 sps:$4 sm:$0xff]   ;;  %v1951_v39 = vld [vmem:[%s3118_s0 + $0x50] ss:$8 sps:$4 sm:$0xff]  }
   0xe   :  { %925 = vmatpush1.bf16.msra.mxu0 %v1904_v4  ;;  %1887 = vmatpush1.bf16.msra.mxu1 %v1904_v4  ;;  %v1952_v40 = vld [vmem:[%s3118_s0 + $0x250] ss:$8 sps:$4 sm:$0xff]   ;;  %v1953_v41 = vld [vmem:[%s3118_s0 + $0x64] ss:$8 sps:$4 sm:$0xff]   ;;  %v1957_v43 = vld [vmem:[%s3118_s0 + $0x60] ss:$8 sps:$4 sm:$0xff]  }
   0xf   :  { %926 = vmatprep.subr.bf16.mxu0 %v2110_v0  ;;  %1872 = vmatprep.subr.bf16.mxu1 %v2110_v0  ;;  %v1955_v42 = vld [vmem:[%s3118_s0 + $0x264] ss:$8 sps:$4 sm:$0xff]   ;;  %v1958_v44 = vld [vmem:[%s3118_s0 + $0x260] ss:$8 sps:$4 sm:$0xff]   ;;  %v1959_v45 = vld [vmem:[%s3118_s0 + $0x74] ss:$8 sps:$4 sm:$0xff]  }
  0x10   :  { %v1961_v46 = vld [vmem:[%s3118_s0 + $0x274] ss:$8 sps:$4 sm:$0xff]   ;;  %v1963_v47 = vld [vmem:[%s3118_s0 + $0x70] ss:$8 sps:$4 sm:$0xff]   ;;  %v1965_v49 = vld [vmem:[%s3118_s0 + $0x84] ss:$8 sps:$4 sm:$0xff]  }
  0x11   :  { %v1964_v48 = vld [vmem:[%s3118_s0 + $0x270] ss:$8 sps:$4 sm:$0xff]   ;;  %v1967_v50 = vld [vmem:[%s3118_s0 + $0x284] ss:$8 sps:$4 sm:$0xff]   ;;  %v1969_v51 = vld [vmem:[%s3118_s0 + $0x80] ss:$8 sps:$4 sm:$0xff]  }
  0x12   :  { %927 = vmatpush1.bf16.msra.mxu0 %v1905_v5  ;;  %1888 = vmatpush1.bf16.msra.mxu1 %v1905_v5  ;;  %v1970_v52 = vld [vmem:[%s3118_s0 + $0x280] ss:$8 sps:$4 sm:$0xff]   ;;  %v1971_v53 = vld [vmem:[%s3118_s0 + $0x94] ss:$8 sps:$4 sm:$0xff]   ;;  %v1975_v55 = vld [vmem:[%s3118_s0 + $0x90] ss:$8 sps:$4 sm:$0xff]  }
  0x13   :  { %928 = vmatprep.subr.bf16.mxu0 %v2110_v0  ;;  %1873 = vmatprep.subr.bf16.mxu1 %v2110_v0  ;;  %v1973_v54 = vld [vmem:[%s3118_s0 + $0x294] ss:$8 sps:$4 sm:$0xff]   ;;  %v1976_v56 = vld [vmem:[%s3118_s0 + $0x290] ss:$8 sps:$4 sm:$0xff]   ;;  %v1977_v57 = vld [vmem:[%s3118_s0 + $0xa4] ss:$8 sps:$4 sm:$0xff]  }
  0x14   :  { %v1979_v58 = vld [vmem:[%s3118_s0 + $0x2a4] ss:$8 sps:$4 sm:$0xff]   ;;  %v1981_v59 = vld [vmem:[%s3118_s0 + $0xa0] ss:$8 sps:$4 sm:$0xff]   ;;  %v1983_v61 = vld [vmem:[%s3118_s0 + $0xb4] ss:$8 sps:$4 sm:$0xff]  }
  0x15   :  { %v1982_v60 = vld [vmem:[%s3118_s0 + $0x2a0] ss:$8 sps:$4 sm:$0xff]   ;;  %v1985_v62 = vld [vmem:[%s3118_s0 + $0x2b4] ss:$8 sps:$4 sm:$0xff]   ;;  %v1987_v63 = vld [vmem:[%s3118_s0 + $0xb0] ss:$8 sps:$4 sm:$0xff]  }
  0x16   :  { %929 = vmatpush1.bf16.msra.mxu0 %v1906_v7  ;;  %1889 = vmatpush1.bf16.msra.mxu1 %v1906_v7  ;;  %v1989_v1 = vld [vmem:[%s3118_s0 + $0xc4] ss:$8 sps:$4 sm:$0xff]   ;;  %v1993_v3 = vld [vmem:[%s3118_s0 + $0xc0] ss:$8 sps:$4 sm:$0xff]   ;;  %v1995_v5 = vld [vmem:[%s3118_s0 + $0xd4] ss:$8 sps:$4 sm:$0xff]  }
  0x17   :  { %930 = vmatprep.subr.bf16.mxu0 %v2110_v0  ;;  %1874 = vmatprep.subr.bf16.mxu1 %v2110_v0  ;;  %v1991_v2 = vld [vmem:[%s3118_s0 + $0x2c4] ss:$8 sps:$4 sm:$0xff]   ;;  %v1994_v4 = vld [vmem:[%s3118_s0 + $0x2c0] ss:$8 sps:$4 sm:$0xff]   ;;  %v1997_v6 = vld [vmem:[%s3118_s0 + $0x2d4] ss:$8 sps:$4 sm:$0xff]  }
  0x18   :  { %v1999_v7 = vld [vmem:[%s3118_s0 + $0xd0] ss:$8 sps:$4 sm:$0xff]  }
  0x19   :  { %v2000_v8 = vld [vmem:[%s3118_s0 + $0x2d0] ss:$8 sps:$4 sm:$0xff]  }
  0x1a   :  { %931 = vmatpush1.bf16.msra.mxu0 %v1907_v9  ;;  %1890 = vmatpush1.bf16.msra.mxu1 %v1907_v9  ;;  %v2001_v9 = vld [vmem:[%s3118_s0 + $0xe4] ss:$8 sps:$4 sm:$0xff]  }
  0x1b   :  { %932 = vmatprep.subr.bf16.mxu0 %v2110_v0  ;;  %1875 = vmatprep.subr.bf16.mxu1 %v2110_v0 }
  0x1e   :  { %933 = vmatpush1.bf16.msra.mxu0 %v1908_v10  ;;  %1891 = vmatpush1.bf16.msra.mxu1 %v1908_v10  ;;  %v2003_v10 = vld [vmem:[%s3118_s0 + $0x2e4] ss:$8 sps:$4 sm:$0xff]  }
  0x1f   :  { %934 = vmatprep.subr.bf16.mxu0 %v2110_v0  ;;  %1876 = vmatprep.subr.bf16.mxu1 %v2110_v0 }
  0x22   :  { %935 = vmatpush2.bf16.msra.mxu0 %v1909_v11  ;;  %1892 = vmatpush2.bf16.msra.mxu1 %v1909_v11  ;;  %v2005_v11 = vld [vmem:[%s3118_s0 + $0xe0] ss:$8 sps:$4 sm:$0xff]  }
  0x23   :  { %936 = vmatprep.subr.bf16.mxu0 %v2110_v0  ;;  %1877 = vmatprep.subr.bf16.mxu1 %v2110_v0 }
  0x26   :  { %937 = vmatpush2.bf16.msra.mxu0 %v1910_v12  ;;  %1893 = vmatpush2.bf16.msra.mxu1 %v1910_v12  ;;  %v2006_v12 = vld [vmem:[%s3118_s0 + $0x2e0] ss:$8 sps:$4 sm:$0xff]  }
  0x27   :  { %938 = vmatprep.subr.bf16.mxu0 %v2110_v0  ;;  %1878 = vmatprep.subr.bf16.mxu1 %v2110_v0 }
  0x2a   :  { %939 = vmatpush2.bf16.msra.mxu0 %v1911_v13  ;;  %1894 = vmatpush2.bf16.msra.mxu1 %v1911_v13  ;;  %v2007_v13 = vld [vmem:[%s3118_s0 + $0xf4] ss:$8 sps:$4 sm:$0xff]  }
  0x2b   :  { %940 = vmatprep.subr.bf16.mxu0 %v2110_v0  ;;  %1879 = vmatprep.subr.bf16.mxu1 %v2110_v0 }
  0x2e   :  { %941 = vmatpush2.bf16.msra.mxu0 %v1912_v14  ;;  %1895 = vmatpush2.bf16.msra.mxu1 %v1912_v14  ;;  %v2009_v14 = vld [vmem:[%s3118_s0 + $0x2f4] ss:$8 sps:$4 sm:$0xff]  }
  0x2f   :  { %942 = vmatprep.subr.bf16.mxu0 %v2110_v0  ;;  %1880 = vmatprep.subr.bf16.mxu1 %v2110_v0 }
  0x32   :  { %943 = vmatpush2.bf16.msra.mxu0 %v1913_v15  ;;  %1896 = vmatpush2.bf16.msra.mxu1 %v1913_v15  ;;  %v2011_v15 = vld [vmem:[%s3118_s0 + $0xf0] ss:$8 sps:$4 sm:$0xff]  }
  0x33   :  { %944 = vmatprep.subr.bf16.mxu0 %v2110_v0  ;;  %1881 = vmatprep.subr.bf16.mxu1 %v2110_v0 }
  0x36   :  { %945 = vmatpush2.bf16.msra.mxu0 %v1914_v16  ;;  %1897 = vmatpush2.bf16.msra.mxu1 %v1914_v16  ;;  %v2012_v16 = vld [vmem:[%s3118_s0 + $0x2f0] ss:$8 sps:$4 sm:$0xff]  }
  0x37   :  { %946 = vmatprep.subr.bf16.mxu0 %v2110_v0  ;;  %1882 = vmatprep.subr.bf16.mxu1 %v2110_v0 }
  0x3a   :  { %947 = vmatpush2.bf16.msra.mxu0 %v1915_v17  ;;  %1898 = vmatpush2.bf16.msra.mxu1 %v1915_v17  ;;  %v2013_v17 = vld [vmem:[%s3118_s0 + $0x104] ss:$8 sps:$4 sm:$0xff]  }
  0x3b   :  { %948 = vmatprep.subr.bf16.mxu0 %v2110_v0  ;;  %1883 = vmatprep.subr.bf16.mxu1 %v2110_v0  ;;  %v1988_v0 = vld [vmem:[%s3118_s0 + $0x2b0] ss:$8 sps:$4 sm:$0xff]  }
  0x3e   :  { %949 = vmatpush2.bf16.msra.mxu0 %v1916_v18  ;;  %1899 = vmatpush2.bf16.msra.mxu1 %v1916_v18  ;;  %v2015_v18 = vld [vmem:[%s3118_s0 + $0x304] ss:$8 sps:$4 sm:$0xff]  }
  0x41   :  { %951 = vmatmul.mubr.bf16.vlgmr.msra.gmra.mxu0 %v1917_v19  ;;  %1207 = vmatmul.mubr.bf16.vlgmr.msra.gmra.mxu1 %v1920_v20  ;;  %v2017_v19 = vld [vmem:[%s3118_s0 + $0x100] ss:$8 sps:$4 sm:$0xff]  }
  0x42   :  { %958 = vmatprep.mubr.bf16.mxu0 %v1923_v21  ;;  %1214 = vmatprep.mubr.bf16.mxu1 %v1925_v22  ;;  %v2018_v20 = vld [vmem:[%s3118_s0 + $0x300] ss:$8 sps:$4 sm:$0xff]   ;;  %v2019_v21 = vld [vmem:[%s3118_s0 + $0x114] ss:$8 sps:$4 sm:$0xff]  }
  0x43   :  { %v2021_v22 = vld [vmem:[%s3118_s0 + $0x314] ss:$8 sps:$4 sm:$0xff]  }
  0x49   :  { %959 = vmatmul.mubr.bf16.gmra.mxu0 %v1927_v23  ;;  %1215 = vmatmul.mubr.bf16.gmra.mxu1 %v1928_v24  ;;  %v2023_v23 = vld [vmem:[%s3118_s0 + $0x110] ss:$8 sps:$4 sm:$0xff]  }
  0x4a   :  { %966 = vmatprep.mubr.bf16.mxu0 %v1929_v25  ;;  %1222 = vmatprep.mubr.bf16.mxu1 %v1931_v26  ;;  %v2024_v24 = vld [vmem:[%s3118_s0 + $0x310] ss:$8 sps:$4 sm:$0xff]   ;;  %v2025_v25 = vld [vmem:[%s3118_s0 + $0x124] ss:$8 sps:$4 sm:$0xff]  }
  0x4b   :  { %v2027_v26 = vld [vmem:[%s3118_s0 + $0x324] ss:$8 sps:$4 sm:$0xff]  }
  0x51   :  { %967 = vmatmul.mubr.bf16.gmra.mxu0 %v1933_v27  ;;  %1223 = vmatmul.mubr.bf16.gmra.mxu1 %v1934_v28  ;;  %v2029_v27 = vld [vmem:[%s3118_s0 + $0x120] ss:$8 sps:$4 sm:$0xff]  }
  0x52   :  { %974 = vmatprep.mubr.bf16.mxu0 %v1935_v29  ;;  %1230 = vmatprep.mubr.bf16.mxu1 %v1937_v30  ;;  %v2030_v28 = vld [vmem:[%s3118_s0 + $0x320] ss:$8 sps:$4 sm:$0xff]   ;;  %v2031_v29 = vld [vmem:[%s3118_s0 + $0x134] ss:$8 sps:$4 sm:$0xff]  }
  0x53   :  { %v2033_v30 = vld [vmem:[%s3118_s0 + $0x334] ss:$8 sps:$4 sm:$0xff]  }
  0x59   :  { %975 = vmatmul.mubr.bf16.gmra.mxu0 %v1939_v31  ;;  %1231 = vmatmul.mubr.bf16.gmra.mxu1 %v1940_v32  ;;  %v2035_v31 = vld [vmem:[%s3118_s0 + $0x130] ss:$8 sps:$4 sm:$0xff]  }
  0x5a   :  { %982 = vmatprep.mubr.bf16.mxu0 %v1941_v33  ;;  %1238 = vmatprep.mubr.bf16.mxu1 %v1943_v34  ;;  %v2036_v32 = vld [vmem:[%s3118_s0 + $0x330] ss:$8 sps:$4 sm:$0xff]   ;;  %v2037_v33 = vld [vmem:[%s3118_s0 + $0x144] ss:$8 sps:$4 sm:$0xff]  }
  0x5b   :  { %v2039_v34 = vld [vmem:[%s3118_s0 + $0x344] ss:$8 sps:$4 sm:$0xff]  }
  0x61   :  { %983 = vmatmul.mubr.bf16.gmra.mxu0 %v1945_v35  ;;  %1239 = vmatmul.mubr.bf16.gmra.mxu1 %v1946_v36  ;;  %v2041_v35 = vld [vmem:[%s3118_s0 + $0x140] ss:$8 sps:$4 sm:$0xff]  }
  0x62   :  { %990 = vmatprep.mubr.bf16.mxu0 %v1947_v37  ;;  %1246 = vmatprep.mubr.bf16.mxu1 %v1949_v38  ;;  %v2042_v36 = vld [vmem:[%s3118_s0 + $0x340] ss:$8 sps:$4 sm:$0xff]   ;;  %v2043_v37 = vld [vmem:[%s3118_s0 + $0x154] ss:$8 sps:$4 sm:$0xff]  }
  0x63   :  { %v2045_v38 = vld [vmem:[%s3118_s0 + $0x354] ss:$8 sps:$4 sm:$0xff]  }
  0x69   :  { %991 = vmatmul.mubr.bf16.gmra.mxu0 %v1951_v39  ;;  %1247 = vmatmul.mubr.bf16.gmra.mxu1 %v1952_v40  ;;  %v2047_v39 = vld [vmem:[%s3118_s0 + $0x150] ss:$8 sps:$4 sm:$0xff]  }
  0x6a   :  { %998 = vmatprep.mubr.bf16.mxu0 %v1953_v41  ;;  %1254 = vmatprep.mubr.bf16.mxu1 %v1955_v42  ;;  %v2048_v40 = vld [vmem:[%s3118_s0 + $0x350] ss:$8 sps:$4 sm:$0xff]   ;;  %v2049_v41 = vld [vmem:[%s3118_s0 + $0x164] ss:$8 sps:$4 sm:$0xff]  }
  0x6b   :  { %v2051_v42 = vld [vmem:[%s3118_s0 + $0x364] ss:$8 sps:$4 sm:$0xff]  }
  0x71   :  { %999 = vmatmul.mubr.bf16.gmra.mxu0 %v1957_v43  ;;  %1255 = vmatmul.mubr.bf16.gmra.mxu1 %v1958_v44  ;;  %v2053_v43 = vld [vmem:[%s3118_s0 + $0x160] ss:$8 sps:$4 sm:$0xff]  }
  0x72   :  { %1006 = vmatprep.mubr.bf16.mxu0 %v1959_v45  ;;  %1262 = vmatprep.mubr.bf16.mxu1 %v1961_v46  ;;  %v2054_v44 = vld [vmem:[%s3118_s0 + $0x360] ss:$8 sps:$4 sm:$0xff]   ;;  %v2055_v45 = vld [vmem:[%s3118_s0 + $0x174] ss:$8 sps:$4 sm:$0xff]  }
  0x73   :  { %v2057_v46 = vld [vmem:[%s3118_s0 + $0x374] ss:$8 sps:$4 sm:$0xff]  }
  0x79   :  { %1007 = vmatmul.mubr.bf16.gmra.mxu0 %v1963_v47  ;;  %1263 = vmatmul.mubr.bf16.gmra.mxu1 %v1964_v48  ;;  %v2059_v47 = vld [vmem:[%s3118_s0 + $0x170] ss:$8 sps:$4 sm:$0xff]  }
  0x7a   :  { %1014 = vmatprep.mubr.bf16.mxu0 %v1965_v49  ;;  %1270 = vmatprep.mubr.bf16.mxu1 %v1967_v50  ;;  %v2060_v48 = vld [vmem:[%s3118_s0 + $0x370] ss:$8 sps:$4 sm:$0xff]   ;;  %v2061_v49 = vld [vmem:[%s3118_s0 + $0x184] ss:$8 sps:$4 sm:$0xff]  }
  0x7b   :  { %v2063_v50 = vld [vmem:[%s3118_s0 + $0x384] ss:$8 sps:$4 sm:$0xff]  }
  0x81   :  { %1015 = vmatmul.mubr.bf16.gmra.mxu0 %v1969_v51  ;;  %1271 = vmatmul.mubr.bf16.gmra.mxu1 %v1970_v52  ;;  %v2065_v51 = vld [vmem:[%s3118_s0 + $0x180] ss:$8 sps:$4 sm:$0xff]  }
  0x82   :  { %1022 = vmatprep.mubr.bf16.mxu0 %v1971_v53  ;;  %1278 = vmatprep.mubr.bf16.mxu1 %v1973_v54  ;;  %v2066_v52 = vld [vmem:[%s3118_s0 + $0x380] ss:$8 sps:$4 sm:$0xff]   ;;  %v2067_v53 = vld [vmem:[%s3118_s0 + $0x194] ss:$8 sps:$4 sm:$0xff]  }
  0x83   :  { %v2069_v54 = vld [vmem:[%s3118_s0 + $0x394] ss:$8 sps:$4 sm:$0xff]  }
  0x89   :  { %1023 = vmatmul.mubr.bf16.gmra.mxu0 %v1975_v55  ;;  %1279 = vmatmul.mubr.bf16.gmra.mxu1 %v1976_v56  ;;  %v2520_v55 = vld [vmem:[%s3119_s2] ss:$0 sm:$0xff] }
  0x8a   :  { %1030 = vmatprep.mubr.bf16.mxu0 %v1977_v57  ;;  %1286 = vmatprep.mubr.bf16.mxu1 %v1979_v58 }
  0x91   :  { %1031 = vmatmul.mubr.bf16.gmra.mxu0 %v1981_v59  ;;  %1287 = vmatmul.mubr.bf16.gmra.mxu1 %v1982_v60 }
  0x92   :  { %1038 = vmatprep.mubr.bf16.mxu0 %v1983_v61  ;;  %1294 = vmatprep.mubr.bf16.mxu1 %v1985_v62 }
  0x99   :  { %1039 = vmatmul.mubr.bf16.gmra.mxu0 %v1987_v63  ;;  %1295 = vmatmul.mubr.bf16.gmra.mxu1 %v1988_v0 }
  0x9a   :  { %1046 = vmatprep.mubr.bf16.mxu0 %v1989_v1  ;;  %1302 = vmatprep.mubr.bf16.mxu1 %v1991_v2  ;;  %v2071_v2 = vld [vmem:[%s3118_s0 + $0x190] ss:$8 sps:$4 sm:$0xff]  }
  0xa1   :  { %1047 = vmatmul.mubr.bf16.gmra.mxu0 %v1993_v3  ;;  %1303 = vmatmul.mubr.bf16.gmra.mxu1 %v1994_v4  ;;  %v2072_v3 = vld [vmem:[%s3118_s0 + $0x390] ss:$8 sps:$4 sm:$0xff]  }
  0xa2   :  { %1054 = vmatprep.mubr.bf16.mxu0 %v1995_v5  ;;  %1310 = vmatprep.mubr.bf16.mxu1 %v1997_v6  ;;  %v2073_v6 = vld [vmem:[%s3118_s0 + $0x1a4] ss:$8 sps:$4 sm:$0xff]  }
  0xa9   :  { %1055 = vmatmul.mubr.bf16.gmra.mxu0 %v1999_v7  ;;  %1311 = vmatmul.mubr.bf16.gmra.mxu1 %v2000_v8  ;;  %v2075_v7 = vld [vmem:[%s3118_s0 + $0x3a4] ss:$8 sps:$4 sm:$0xff]  }
  0xaa   :  { %1062 = vmatprep.mubr.bf16.mxu0 %v2001_v9  ;;  %1318 = vmatprep.mubr.bf16.mxu1 %v2003_v10 }
  0xb1   :  { %1063 = vmatmul.mubr.bf16.gmra.mxu0 %v2005_v11  ;;  %1319 = vmatmul.mubr.bf16.gmra.mxu1 %v2006_v12 }
  0xb2   :  { %1070 = vmatprep.mubr.bf16.mxu0 %v2007_v13  ;;  %1326 = vmatprep.mubr.bf16.mxu1 %v2009_v14 }
  0xb9   :  { %1071 = vmatmul.mubr.bf16.gmra.mxu0 %v2011_v15  ;;  %1327 = vmatmul.mubr.bf16.gmra.mxu1 %v2012_v16 }
  0xba   :  { %1078 = vmatprep.mubr.bf16.mxu0 %v2013_v17  ;;  %1334 = vmatprep.mubr.bf16.mxu1 %v2015_v18 }
  0xc1   :  { %1079 = vmatmul.mubr.bf16.gmra.mxu0 %v2017_v19  ;;  %1335 = vmatmul.mubr.bf16.gmra.mxu1 %v2018_v20 }
  0xc2   :  { %1086 = vmatprep.mubr.bf16.mxu0 %v2019_v21  ;;  %1342 = vmatprep.mubr.bf16.mxu1 %v2021_v22  ;;  %v2077_v22 = vld [vmem:[%s3118_s0 + $0x1a0] ss:$8 sps:$4 sm:$0xff]  }
  0xc9   :  { %1087 = vmatmul.mubr.bf16.gmra.mxu0 %v2023_v23  ;;  %1343 = vmatmul.mubr.bf16.gmra.mxu1 %v2024_v24  ;;  %v2078_v23 = vld [vmem:[%s3118_s0 + $0x3a0] ss:$8 sps:$4 sm:$0xff]  }
  0xca   :  { %1094 = vmatprep.mubr.bf16.mxu0 %v2025_v25  ;;  %1350 = vmatprep.mubr.bf16.mxu1 %v2027_v26  ;;  %v2079_v26 = vld [vmem:[%s3118_s0 + $0x1b4] ss:$8 sps:$4 sm:$0xff]  }
  0xd1   :  { %1095 = vmatmul.mubr.bf16.gmra.mxu0 %v2029_v27  ;;  %1351 = vmatmul.mubr.bf16.gmra.mxu1 %v2030_v28  ;;  %v2081_v27 = vld [vmem:[%s3118_s0 + $0x3b4] ss:$8 sps:$4 sm:$0xff]  }
  0xd2   :  { %1102 = vmatprep.mubr.bf16.mxu0 %v2031_v29  ;;  %1358 = vmatprep.mubr.bf16.mxu1 %v2033_v30 }
  0xd9   :  { %1103 = vmatmul.mubr.bf16.gmra.mxu0 %v2035_v31  ;;  %1359 = vmatmul.mubr.bf16.gmra.mxu1 %v2036_v32 }
  0xda   :  { %1110 = vmatprep.mubr.bf16.mxu0 %v2037_v33  ;;  %1366 = vmatprep.mubr.bf16.mxu1 %v2039_v34 }
  0xe1   :  { %1111 = vmatmul.mubr.bf16.gmra.mxu0 %v2041_v35  ;;  %1367 = vmatmul.mubr.bf16.gmra.mxu1 %v2042_v36 }
  0xe2   :  { %1118 = vmatprep.mubr.bf16.mxu0 %v2043_v37  ;;  %1374 = vmatprep.mubr.bf16.mxu1 %v2045_v38 }
  0xe9   :  { %1119 = vmatmul.mubr.bf16.gmra.mxu0 %v2047_v39  ;;  %1375 = vmatmul.mubr.bf16.gmra.mxu1 %v2048_v40 }
  0xea   :  { %1126 = vmatprep.mubr.bf16.mxu0 %v2049_v41  ;;  %1382 = vmatprep.mubr.bf16.mxu1 %v2051_v42  ;;  %v2083_v42 = vld [vmem:[%s3118_s0 + $0x1b0] ss:$8 sps:$4 sm:$0xff]  }
  0xf1   :  { %1127 = vmatmul.mubr.bf16.gmra.mxu0 %v2053_v43  ;;  %1383 = vmatmul.mubr.bf16.gmra.mxu1 %v2054_v44  ;;  %v2084_v43 = vld [vmem:[%s3118_s0 + $0x3b0] ss:$8 sps:$4 sm:$0xff]  }
  0xf2   :  { %1134 = vmatprep.mubr.bf16.mxu0 %v2055_v45  ;;  %1390 = vmatprep.mubr.bf16.mxu1 %v2057_v46  ;;  %v2087_v46 = vld [vmem:[%s3118_s0 + $0x1c4] ss:$8 sps:$4 sm:$0xff]  }
  0xf9   :  { %1135 = vmatmul.mubr.bf16.gmra.mxu0 %v2059_v47  ;;  %1391 = vmatmul.mubr.bf16.gmra.mxu1 %v2060_v48  ;;  %v2090_v47 = vld [vmem:[%s3118_s0 + $0x3c4] ss:$8 sps:$4 sm:$0xff]  }
  0xfa   :  { %1142 = vmatprep.mubr.bf16.mxu0 %v2061_v49  ;;  %1398 = vmatprep.mubr.bf16.mxu1 %v2063_v50 }
 0x101   :  { %v952_v56 = vpop.f32.mrf.mxu0  ;;  %1143 = vmatmul.mubr.bf16.gmra.mxu0 %v2065_v51  ;;  %v1208_v57 = vpop.f32.mrf.mxu1  ;;  %1399 = vmatmul.mubr.bf16.gmra.mxu1 %v2066_v52 }
 0x102   :  { %v953_v58 = vadd.f32 %v2520_v55, %v952_v56  ;;  %v1209_v59 = vadd.f32 %v2520_v55, %v1208_v57  ;;  %1150 = vmatprep.mubr.bf16.mxu0 %v2067_v53  ;;  %1406 = vmatprep.mubr.bf16.mxu1 %v2069_v54 }
 0x103   :  { %v954_v60 = vpop.f32.mrf.mxu0  ;;  %v1210_v61 = vpop.f32.mrf.mxu1 }
 0x104   :  { %v1463_v62 = vmax.f32 %v953_v58, 0.0  ;;  %v1527_v63 = vmax.f32 %v1209_v59, 0.0 }
 0x105   :  { %v955_v0 = vpop.f32.mrf.mxu0  ;;  %v1211_v1 = vpop.f32.mrf.mxu1 }
 0x106   :  { %1591 = vst [vmem:[%s3120_s3] sm:$0xff] %v1463_v62  ;;  %1655 = vst [vmem:[%s3120_s3 + $0x200] sm:$0xff] %v1527_v63  ;;  %v956_v4 = vadd.f32 %v2520_v55, %v955_v0  ;;  %v1212_v5 = vadd.f32 %v2520_v55, %v1211_v1  ;;  %v2085_v63 = vld [vmem:[%s3118_s0 + $0x1c0] ss:$8 sps:$4 sm:$0xff]  }
 0x107   :  { %v957_v8 = vpop.f32.mrf.mxu0  ;;  %v1213_v9 = vpop.f32.mrf.mxu1  ;;  %v2088_v0 = vld [vmem:[%s3118_s0 + $0x3c0] ss:$8 sps:$4 sm:$0xff]  }
 0x108   :  { %v1464_v10 = vmax.f32 %v956_v4, 0.0  ;;  %v1528_v11 = vmax.f32 %v1212_v5, 0.0  ;;  %v2096_v4 = vld [vmem:[%s3118_s0 + $0x3d4] ss:$8 sps:$4 sm:$0xff]  }
 0x109   :  { %v960_v12 = vpop.f32.mrf.mxu0  ;;  %1151 = vmatmul.mubr.bf16.gmra.mxu0 %v2071_v2  ;;  %v1216_v13 = vpop.f32.mrf.mxu1  ;;  %1407 = vmatmul.mubr.bf16.gmra.mxu1 %v2072_v3  ;;  %v2093_v3 = vld [vmem:[%s3118_s0 + $0x1d4] ss:$8 sps:$4 sm:$0xff]  }
 0x10a   :  { %1592 = vst [vmem:[%s3120_s3 + $0x8] sm:$0xff] %v1464_v10  ;;  %1656 = vst [vmem:[%s3120_s3 + $0x208] sm:$0xff] %v1528_v11  ;;  %v961_v14 = vadd.f32 %v2520_v55, %v960_v12  ;;  %v1217_v15 = vadd.f32 %v2520_v55, %v1216_v13  ;;  %1158 = vmatprep.mubr.bf16.mxu0 %v2073_v6  ;;  %1414 = vmatprep.mubr.bf16.mxu1 %v2075_v7 }
 0x10b   :  { %v962_v16 = vpop.f32.mrf.mxu0  ;;  %v1218_v17 = vpop.f32.mrf.mxu1 }
 0x10c   :  { %v1465_v18 = vmax.f32 %v961_v14, 0.0  ;;  %v1529_v19 = vmax.f32 %v1217_v15, 0.0 }
 0x10d   :  { %v963_v20 = vpop.f32.mrf.mxu0  ;;  %v1219_v21 = vpop.f32.mrf.mxu1 }
 0x10e   :  { %1593 = vst [vmem:[%s3120_s3 + $0x10] sm:$0xff] %v1465_v18  ;;  %1657 = vst [vmem:[%s3120_s3 + $0x210] sm:$0xff] %v1529_v19  ;;  %v964_v24 = vadd.f32 %v2520_v55, %v963_v20  ;;  %v1220_v25 = vadd.f32 %v2520_v55, %v1219_v21  ;;  %v2091_v19 = vld [vmem:[%s3118_s0 + $0x1d0] ss:$8 sps:$4 sm:$0xff]  }
 0x10f   :  { %v965_v28 = vpop.f32.mrf.mxu0  ;;  %v1221_v29 = vpop.f32.mrf.mxu1  ;;  %v2094_v20 = vld [vmem:[%s3118_s0 + $0x3d0] ss:$8 sps:$4 sm:$0xff]  }
 0x110   :  { %v1466_v30 = vmax.f32 %v964_v24, 0.0  ;;  %v1530_v31 = vmax.f32 %v1220_v25, 0.0  ;;  %v2102_v24 = vld [vmem:[%s3118_s0 + $0x3e4] ss:$8 sps:$4 sm:$0xff]  }
 0x111   :  { %v968_v32 = vpop.f32.mrf.mxu0  ;;  %1159 = vmatmul.mubr.bf16.gmra.mxu0 %v2077_v22  ;;  %v1224_v33 = vpop.f32.mrf.mxu1  ;;  %1415 = vmatmul.mubr.bf16.gmra.mxu1 %v2078_v23  ;;  %v2099_v23 = vld [vmem:[%s3118_s0 + $0x1e4] ss:$8 sps:$4 sm:$0xff]  }
 0x112   :  { %1594 = vst [vmem:[%s3120_s3 + $0x18] sm:$0xff] %v1466_v30  ;;  %1658 = vst [vmem:[%s3120_s3 + $0x218] sm:$0xff] %v1530_v31  ;;  %v969_v34 = vadd.f32 %v2520_v55, %v968_v32  ;;  %v1225_v35 = vadd.f32 %v2520_v55, %v1224_v33  ;;  %1166 = vmatprep.mubr.bf16.mxu0 %v2079_v26  ;;  %1422 = vmatprep.mubr.bf16.mxu1 %v2081_v27 }
 0x113   :  { %v970_v36 = vpop.f32.mrf.mxu0  ;;  %v1226_v37 = vpop.f32.mrf.mxu1 }
 0x114   :  { %v1467_v38 = vmax.f32 %v969_v34, 0.0  ;;  %v1531_v39 = vmax.f32 %v1225_v35, 0.0 }
 0x115   :  { %v971_v40 = vpop.f32.mrf.mxu0  ;;  %v1227_v41 = vpop.f32.mrf.mxu1 }
 0x116   :  { %1595 = vst [vmem:[%s3120_s3 + $0x20] sm:$0xff] %v1467_v38  ;;  %1659 = vst [vmem:[%s3120_s3 + $0x220] sm:$0xff] %v1531_v39  ;;  %v972_v44 = vadd.f32 %v2520_v55, %v971_v40  ;;  %v1228_v45 = vadd.f32 %v2520_v55, %v1227_v41  ;;  %v2097_v39 = vld [vmem:[%s3118_s0 + $0x1e0] ss:$8 sps:$4 sm:$0xff]  }
 0x117   :  { %v973_v48 = vpop.f32.mrf.mxu0  ;;  %v1229_v49 = vpop.f32.mrf.mxu1  ;;  %v2100_v40 = vld [vmem:[%s3118_s0 + $0x3e0] ss:$8 sps:$4 sm:$0xff]  }
 0x118   :  { %v1468_v50 = vmax.f32 %v972_v44, 0.0  ;;  %v1532_v51 = vmax.f32 %v1228_v45, 0.0  ;;  %v2108_v44 = vld [vmem:[%s3118_s0 + $0x3f4] ss:$8 sps:$4 sm:$0xff]  }
 0x119   :  { %v976_v52 = vpop.f32.mrf.mxu0  ;;  %1167 = vmatmul.mubr.bf16.gmra.mxu0 %v2083_v42  ;;  %v1232_v53 = vpop.f32.mrf.mxu1  ;;  %1423 = vmatmul.mubr.bf16.gmra.mxu1 %v2084_v43  ;;  %v2105_v43 = vld [vmem:[%s3118_s0 + $0x1f4] ss:$8 sps:$4 sm:$0xff]  }
 0x11a   :  { %1596 = vst [vmem:[%s3120_s3 + $0x28] sm:$0xff] %v1468_v50  ;;  %1660 = vst [vmem:[%s3120_s3 + $0x228] sm:$0xff] %v1532_v51  ;;  %v977_v54 = vadd.f32 %v2520_v55, %v976_v52  ;;  %v1233_v56 = vadd.f32 %v2520_v55, %v1232_v53  ;;  %1174 = vmatprep.mubr.bf16.mxu0 %v2087_v46  ;;  %1430 = vmatprep.mubr.bf16.mxu1 %v2090_v47 }
 0x11b   :  { %v978_v57 = vpop.f32.mrf.mxu0  ;;  %v1234_v58 = vpop.f32.mrf.mxu1 }
 0x11c   :  { %v1469_v59 = vmax.f32 %v977_v54, 0.0  ;;  %v1533_v60 = vmax.f32 %v1233_v56, 0.0 }
 0x11d   :  { %v979_v61 = vpop.f32.mrf.mxu0  ;;  %v1235_v62 = vpop.f32.mrf.mxu1 }
 0x11e   :  { %1597 = vst [vmem:[%s3120_s3 + $0x30] sm:$0xff] %v1469_v59  ;;  %1661 = vst [vmem:[%s3120_s3 + $0x230] sm:$0xff] %v1533_v60  ;;  %v980_v1 = vadd.f32 %v2520_v55, %v979_v61  ;;  %v1236_v2 = vadd.f32 %v2520_v55, %v1235_v62  ;;  %v2103_v60 = vld [vmem:[%s3118_s0 + $0x1f0] ss:$8 sps:$4 sm:$0xff]  }
 0x11f   :  { %v981_v5 = vpop.f32.mrf.mxu0  ;;  %v1237_v6 = vpop.f32.mrf.mxu1  ;;  %v2106_v61 = vld [vmem:[%s3118_s0 + $0x3f0] ss:$8 sps:$4 sm:$0xff]  }
 0x120   :  { %v1470_v7 = vmax.f32 %v980_v1, 0.0  ;;  %v1534_v8 = vmax.f32 %v1236_v2, 0.0 }
 0x121   :  { %v984_v9 = vpop.f32.mrf.mxu0  ;;  %1175 = vmatmul.mubr.bf16.gmra.mxu0 %v2085_v63  ;;  %v1240_v10 = vpop.f32.mrf.mxu1  ;;  %1431 = vmatmul.mubr.bf16.gmra.mxu1 %v2088_v0 }
 0x122   :  { %1598 = vst [vmem:[%s3120_s3 + $0x38] sm:$0xff] %v1470_v7  ;;  %1662 = vst [vmem:[%s3120_s3 + $0x238] sm:$0xff] %v1534_v8  ;;  %v985_v11 = vadd.f32 %v2520_v55, %v984_v9  ;;  %v1241_v12 = vadd.f32 %v2520_v55, %v1240_v10  ;;  %1182 = vmatprep.mubr.bf16.mxu0 %v2093_v3  ;;  %1438 = vmatprep.mubr.bf16.mxu1 %v2096_v4 }
 0x123   :  { %v986_v13 = vpop.f32.mrf.mxu0  ;;  %v1242_v14 = vpop.f32.mrf.mxu1 }
 0x124   :  { %v1471_v15 = vmax.f32 %v985_v11, 0.0  ;;  %v1535_v16 = vmax.f32 %v1241_v12, 0.0 }
 0x125   :  { %v987_v17 = vpop.f32.mrf.mxu0  ;;  %v1243_v18 = vpop.f32.mrf.mxu1 }
 0x126   :  { %1599 = vst [vmem:[%s3120_s3 + $0x40] sm:$0xff] %v1471_v15  ;;  %1663 = vst [vmem:[%s3120_s3 + $0x240] sm:$0xff] %v1535_v16  ;;  %v988_v21 = vadd.f32 %v2520_v55, %v987_v17  ;;  %v1244_v22 = vadd.f32 %v2520_v55, %v1243_v18 }
 0x127   :  { %v989_v25 = vpop.f32.mrf.mxu0  ;;  %v1245_v26 = vpop.f32.mrf.mxu1 }
 0x128   :  { %v1472_v27 = vmax.f32 %v988_v21, 0.0  ;;  %v1536_v28 = vmax.f32 %v1244_v22, 0.0 }
 0x129   :  { %v992_v29 = vpop.f32.mrf.mxu0  ;;  %1183 = vmatmul.mubr.bf16.gmra.mxu0 %v2091_v19  ;;  %v1248_v30 = vpop.f32.mrf.mxu1  ;;  %1439 = vmatmul.mubr.bf16.gmra.mxu1 %v2094_v20 }
 0x12a   :  { %1600 = vst [vmem:[%s3120_s3 + $0x48] sm:$0xff] %v1472_v27  ;;  %1664 = vst [vmem:[%s3120_s3 + $0x248] sm:$0xff] %v1536_v28  ;;  %v993_v31 = vadd.f32 %v2520_v55, %v992_v29  ;;  %v1249_v32 = vadd.f32 %v2520_v55, %v1248_v30  ;;  %1190 = vmatprep.mubr.bf16.mxu0 %v2099_v23  ;;  %1446 = vmatprep.mubr.bf16.mxu1 %v2102_v24 }
 0x12b   :  { %v994_v33 = vpop.f32.mrf.mxu0  ;;  %v1250_v34 = vpop.f32.mrf.mxu1 }
 0x12c   :  { %v1473_v35 = vmax.f32 %v993_v31, 0.0  ;;  %v1537_v36 = vmax.f32 %v1249_v32, 0.0 }
 0x12d   :  { %v995_v37 = vpop.f32.mrf.mxu0  ;;  %v1251_v38 = vpop.f32.mrf.mxu1 }
 0x12e   :  { %1601 = vst [vmem:[%s3120_s3 + $0x50] sm:$0xff] %v1473_v35  ;;  %1665 = vst [vmem:[%s3120_s3 + $0x250] sm:$0xff] %v1537_v36  ;;  %v996_v41 = vadd.f32 %v2520_v55, %v995_v37  ;;  %v1252_v42 = vadd.f32 %v2520_v55, %v1251_v38 }
 0x12f   :  { %v997_v45 = vpop.f32.mrf.mxu0  ;;  %v1253_v46 = vpop.f32.mrf.mxu1 }
 0x130   :  { %v1474_v47 = vmax.f32 %v996_v41, 0.0  ;;  %v1538_v48 = vmax.f32 %v1252_v42, 0.0 }
 0x131   :  { %v1000_v49 = vpop.f32.mrf.mxu0  ;;  %1191 = vmatmul.mubr.bf16.gmra.mxu0 %v2097_v39  ;;  %v1256_v50 = vpop.f32.mrf.mxu1  ;;  %1447 = vmatmul.mubr.bf16.gmra.mxu1 %v2100_v40 }
 0x132   :  { %1602 = vst [vmem:[%s3120_s3 + $0x58] sm:$0xff] %v1474_v47  ;;  %1666 = vst [vmem:[%s3120_s3 + $0x258] sm:$0xff] %v1538_v48  ;;  %v1001_v51 = vadd.f32 %v2520_v55, %v1000_v49  ;;  %v1257_v52 = vadd.f32 %v2520_v55, %v1256_v50  ;;  %1198 = vmatprep.mubr.bf16.mxu0 %v2105_v43  ;;  %1454 = vmatprep.mubr.bf16.mxu1 %v2108_v44 }
 0x133   :  { %v1002_v53 = vpop.f32.mrf.mxu0  ;;  %v1258_v54 = vpop.f32.mrf.mxu1 }
 0x134   :  { %v1475_v56 = vmax.f32 %v1001_v51, 0.0  ;;  %v1539_v57 = vmax.f32 %v1257_v52, 0.0 }
 0x135   :  { %v1003_v58 = vpop.f32.mrf.mxu0  ;;  %v1259_v59 = vpop.f32.mrf.mxu1 }
 0x136   :  { %1603 = vst [vmem:[%s3120_s3 + $0x60] sm:$0xff] %v1475_v56  ;;  %1667 = vst [vmem:[%s3120_s3 + $0x260] sm:$0xff] %v1539_v57  ;;  %v1004_v62 = vadd.f32 %v2520_v55, %v1003_v58  ;;  %v1260_v63 = vadd.f32 %v2520_v55, %v1259_v59 }
 0x137   :  { %v1005_v0 = vpop.f32.mrf.mxu0  ;;  %v1261_v1 = vpop.f32.mrf.mxu1 }
 0x138   :  { %v1476_v2 = vmax.f32 %v1004_v62, 0.0  ;;  %v1540_v3 = vmax.f32 %v1260_v63, 0.0 }
 0x139   :  { %v1008_v4 = vpop.f32.mrf.mxu0  ;;  %1199 = vmatmul.mubr.bf16.gmra.mxu0 %v2103_v60  ;;  %v1264_v5 = vpop.f32.mrf.mxu1  ;;  %1455 = vmatmul.mubr.bf16.gmra.mxu1 %v2106_v61 }
 0x13a   :  { %1604 = vst [vmem:[%s3120_s3 + $0x68] sm:$0xff] %v1476_v2  ;;  %1668 = vst [vmem:[%s3120_s3 + $0x268] sm:$0xff] %v1540_v3  ;;  %v1009_v6 = vadd.f32 %v2520_v55, %v1008_v4  ;;  %v1265_v7 = vadd.f32 %v2520_v55, %v1264_v5 }
 0x13b   :  { %v1010_v8 = vpop.f32.mrf.mxu0  ;;  %v1266_v9 = vpop.f32.mrf.mxu1 }
 0x13c   :  { %v1477_v10 = vmax.f32 %v1009_v6, 0.0  ;;  %v1541_v11 = vmax.f32 %v1265_v7, 0.0 }
 0x13d   :  { %v1011_v12 = vpop.f32.mrf.mxu0  ;;  %v1267_v13 = vpop.f32.mrf.mxu1 }
 0x13e   :  { %1605 = vst [vmem:[%s3120_s3 + $0x70] sm:$0xff] %v1477_v10  ;;  %1669 = vst [vmem:[%s3120_s3 + $0x270] sm:$0xff] %v1541_v11  ;;  %v1012_v14 = vadd.f32 %v2520_v55, %v1011_v12  ;;  %v1268_v15 = vadd.f32 %v2520_v55, %v1267_v13 }
 0x13f   :  { %v1013_v16 = vpop.f32.mrf.mxu0  ;;  %v1269_v17 = vpop.f32.mrf.mxu1 }
 0x140   :  { %v1478_v18 = vmax.f32 %v1012_v14, 0.0  ;;  %v1542_v19 = vmax.f32 %v1268_v15, 0.0 }
 0x141   :  { %v1016_v20 = vpop.f32.mrf.mxu0  ;;  %v1272_v21 = vpop.f32.mrf.mxu1 }
 0x142   :  { %1606 = vst [vmem:[%s3120_s3 + $0x78] sm:$0xff] %v1478_v18  ;;  %1670 = vst [vmem:[%s3120_s3 + $0x278] sm:$0xff] %v1542_v19  ;;  %v1017_v22 = vadd.f32 %v2520_v55, %v1016_v20  ;;  %v1273_v23 = vadd.f32 %v2520_v55, %v1272_v21 }
 0x143   :  { %v1018_v24 = vpop.f32.mrf.mxu0  ;;  %v1274_v25 = vpop.f32.mrf.mxu1 }
 0x144   :  { %v1479_v26 = vmax.f32 %v1017_v22, 0.0  ;;  %v1543_v27 = vmax.f32 %v1273_v23, 0.0 }
 0x145   :  { %v1019_v28 = vpop.f32.mrf.mxu0  ;;  %v1275_v29 = vpop.f32.mrf.mxu1 }
 0x146   :  { %1607 = vst [vmem:[%s3120_s3 + $0x80] sm:$0xff] %v1479_v26  ;;  %1671 = vst [vmem:[%s3120_s3 + $0x280] sm:$0xff] %v1543_v27  ;;  %v1020_v30 = vadd.f32 %v2520_v55, %v1019_v28  ;;  %v1276_v31 = vadd.f32 %v2520_v55, %v1275_v29 }
 0x147   :  { %v1021_v32 = vpop.f32.mrf.mxu0  ;;  %v1277_v33 = vpop.f32.mrf.mxu1 }
 0x148   :  { %v1480_v34 = vmax.f32 %v1020_v30, 0.0  ;;  %v1544_v35 = vmax.f32 %v1276_v31, 0.0 }
 0x149   :  { %v1024_v36 = vpop.f32.mrf.mxu0  ;;  %v1280_v37 = vpop.f32.mrf.mxu1 }
 0x14a   :  { %1608 = vst [vmem:[%s3120_s3 + $0x88] sm:$0xff] %v1480_v34  ;;  %1672 = vst [vmem:[%s3120_s3 + $0x288] sm:$0xff] %v1544_v35  ;;  %v1025_v38 = vadd.f32 %v2520_v55, %v1024_v36  ;;  %v1281_v39 = vadd.f32 %v2520_v55, %v1280_v37 }
 0x14b   :  { %v1026_v40 = vpop.f32.mrf.mxu0  ;;  %v1282_v41 = vpop.f32.mrf.mxu1 }
 0x14c   :  { %v1481_v42 = vmax.f32 %v1025_v38, 0.0  ;;  %v1545_v43 = vmax.f32 %v1281_v39, 0.0 }
 0x14d   :  { %v1027_v44 = vpop.f32.mrf.mxu0  ;;  %v1283_v45 = vpop.f32.mrf.mxu1 }
 0x14e   :  { %1609 = vst [vmem:[%s3120_s3 + $0x90] sm:$0xff] %v1481_v42  ;;  %1673 = vst [vmem:[%s3120_s3 + $0x290] sm:$0xff] %v1545_v43  ;;  %v1028_v46 = vadd.f32 %v2520_v55, %v1027_v44  ;;  %v1284_v47 = vadd.f32 %v2520_v55, %v1283_v45 }
 0x14f   :  { %v1029_v48 = vpop.f32.mrf.mxu0  ;;  %v1285_v49 = vpop.f32.mrf.mxu1 }
 0x150   :  { %v1482_v50 = vmax.f32 %v1028_v46, 0.0  ;;  %v1546_v51 = vmax.f32 %v1284_v47, 0.0 }
 0x151   :  { %v1032_v52 = vpop.f32.mrf.mxu0  ;;  %v1288_v53 = vpop.f32.mrf.mxu1 }
 0x152   :  { %1610 = vst [vmem:[%s3120_s3 + $0x98] sm:$0xff] %v1482_v50  ;;  %1674 = vst [vmem:[%s3120_s3 + $0x298] sm:$0xff] %v1546_v51  ;;  %v1033_v54 = vadd.f32 %v2520_v55, %v1032_v52  ;;  %v1289_v56 = vadd.f32 %v2520_v55, %v1288_v53 }
 0x153   :  { %v1034_v57 = vpop.f32.mrf.mxu0  ;;  %v1290_v58 = vpop.f32.mrf.mxu1 }
 0x154   :  { %v1483_v59 = vmax.f32 %v1033_v54, 0.0  ;;  %v1547_v60 = vmax.f32 %v1289_v56, 0.0 }
 0x155   :  { %v1035_v61 = vpop.f32.mrf.mxu0  ;;  %v1291_v62 = vpop.f32.mrf.mxu1 }
 0x156   :  { %1611 = vst [vmem:[%s3120_s3 + $0xa0] sm:$0xff] %v1483_v59  ;;  %1675 = vst [vmem:[%s3120_s3 + $0x2a0] sm:$0xff] %v1547_v60  ;;  %v1036_v63 = vadd.f32 %v2520_v55, %v1035_v61  ;;  %v1292_v0 = vadd.f32 %v2520_v55, %v1291_v62 }
 0x157   :  { %v1037_v1 = vpop.f32.mrf.mxu0  ;;  %v1293_v2 = vpop.f32.mrf.mxu1 }
 0x158   :  { %v1484_v3 = vmax.f32 %v1036_v63, 0.0  ;;  %v1548_v4 = vmax.f32 %v1292_v0, 0.0 }
 0x159   :  { %v1040_v5 = vpop.f32.mrf.mxu0  ;;  %v1296_v6 = vpop.f32.mrf.mxu1 }
 0x15a   :  { %1612 = vst [vmem:[%s3120_s3 + $0xa8] sm:$0xff] %v1484_v3  ;;  %1676 = vst [vmem:[%s3120_s3 + $0x2a8] sm:$0xff] %v1548_v4  ;;  %v1041_v7 = vadd.f32 %v2520_v55, %v1040_v5  ;;  %v1297_v8 = vadd.f32 %v2520_v55, %v1296_v6 }
 0x15b   :  { %v1042_v9 = vpop.f32.mrf.mxu0  ;;  %v1298_v10 = vpop.f32.mrf.mxu1 }
 0x15c   :  { %v1485_v11 = vmax.f32 %v1041_v7, 0.0  ;;  %v1549_v12 = vmax.f32 %v1297_v8, 0.0 }
 0x15d   :  { %v1043_v13 = vpop.f32.mrf.mxu0  ;;  %v1299_v14 = vpop.f32.mrf.mxu1 }
 0x15e   :  { %1613 = vst [vmem:[%s3120_s3 + $0xb0] sm:$0xff] %v1485_v11  ;;  %1677 = vst [vmem:[%s3120_s3 + $0x2b0] sm:$0xff] %v1549_v12  ;;  %v1044_v15 = vadd.f32 %v2520_v55, %v1043_v13  ;;  %v1300_v16 = vadd.f32 %v2520_v55, %v1299_v14 }
 0x15f   :  { %v1045_v17 = vpop.f32.mrf.mxu0  ;;  %v1301_v18 = vpop.f32.mrf.mxu1 }
 0x160   :  { %v1486_v19 = vmax.f32 %v1044_v15, 0.0  ;;  %v1550_v20 = vmax.f32 %v1300_v16, 0.0 }
 0x161   :  { %v1048_v21 = vpop.f32.mrf.mxu0  ;;  %v1304_v22 = vpop.f32.mrf.mxu1 }
 0x162   :  { %1614 = vst [vmem:[%s3120_s3 + $0xb8] sm:$0xff] %v1486_v19  ;;  %1678 = vst [vmem:[%s3120_s3 + $0x2b8] sm:$0xff] %v1550_v20  ;;  %v1049_v23 = vadd.f32 %v2520_v55, %v1048_v21  ;;  %v1305_v24 = vadd.f32 %v2520_v55, %v1304_v22 }
 0x163   :  { %v1050_v25 = vpop.f32.mrf.mxu0  ;;  %v1306_v26 = vpop.f32.mrf.mxu1 }
 0x164   :  { %v1487_v27 = vmax.f32 %v1049_v23, 0.0  ;;  %v1551_v28 = vmax.f32 %v1305_v24, 0.0 }
 0x165   :  { %v1051_v29 = vpop.f32.mrf.mxu0  ;;  %v1307_v30 = vpop.f32.mrf.mxu1 }
 0x166   :  { %1615 = vst [vmem:[%s3120_s3 + $0xc0] sm:$0xff] %v1487_v27  ;;  %1679 = vst [vmem:[%s3120_s3 + $0x2c0] sm:$0xff] %v1551_v28  ;;  %v1052_v31 = vadd.f32 %v2520_v55, %v1051_v29  ;;  %v1308_v32 = vadd.f32 %v2520_v55, %v1307_v30 }
 0x167   :  { %v1053_v33 = vpop.f32.mrf.mxu0  ;;  %v1309_v34 = vpop.f32.mrf.mxu1 }
 0x168   :  { %v1488_v35 = vmax.f32 %v1052_v31, 0.0  ;;  %v1552_v36 = vmax.f32 %v1308_v32, 0.0 }
 0x169   :  { %v1056_v37 = vpop.f32.mrf.mxu0  ;;  %v1312_v38 = vpop.f32.mrf.mxu1 }
 0x16a   :  { %1616 = vst [vmem:[%s3120_s3 + $0xc8] sm:$0xff] %v1488_v35  ;;  %1680 = vst [vmem:[%s3120_s3 + $0x2c8] sm:$0xff] %v1552_v36  ;;  %v1057_v39 = vadd.f32 %v2520_v55, %v1056_v37  ;;  %v1313_v40 = vadd.f32 %v2520_v55, %v1312_v38 }
 0x16b   :  { %v1058_v41 = vpop.f32.mrf.mxu0  ;;  %v1314_v42 = vpop.f32.mrf.mxu1 }
 0x16c   :  { %v1489_v43 = vmax.f32 %v1057_v39, 0.0  ;;  %v1553_v44 = vmax.f32 %v1313_v40, 0.0 }
 0x16d   :  { %v1059_v45 = vpop.f32.mrf.mxu0  ;;  %v1315_v46 = vpop.f32.mrf.mxu1 }
 0x16e   :  { %1617 = vst [vmem:[%s3120_s3 + $0xd0] sm:$0xff] %v1489_v43  ;;  %1681 = vst [vmem:[%s3120_s3 + $0x2d0] sm:$0xff] %v1553_v44  ;;  %v1060_v47 = vadd.f32 %v2520_v55, %v1059_v45  ;;  %v1316_v48 = vadd.f32 %v2520_v55, %v1315_v46 }
 0x16f   :  { %v1061_v49 = vpop.f32.mrf.mxu0  ;;  %v1317_v50 = vpop.f32.mrf.mxu1 }
 0x170   :  { %v1490_v51 = vmax.f32 %v1060_v47, 0.0  ;;  %v1554_v52 = vmax.f32 %v1316_v48, 0.0 }
 0x171   :  { %v1064_v53 = vpop.f32.mrf.mxu0  ;;  %v1320_v54 = vpop.f32.mrf.mxu1 }
 0x172   :  { %1618 = vst [vmem:[%s3120_s3 + $0xd8] sm:$0xff] %v1490_v51  ;;  %1682 = vst [vmem:[%s3120_s3 + $0x2d8] sm:$0xff] %v1554_v52  ;;  %v1065_v56 = vadd.f32 %v2520_v55, %v1064_v53  ;;  %v1321_v57 = vadd.f32 %v2520_v55, %v1320_v54 }
 0x173   :  { %v1066_v58 = vpop.f32.mrf.mxu0  ;;  %v1322_v59 = vpop.f32.mrf.mxu1 }
 0x174   :  { %v1491_v60 = vmax.f32 %v1065_v56, 0.0  ;;  %v1555_v61 = vmax.f32 %v1321_v57, 0.0 }
 0x175   :  { %v1067_v62 = vpop.f32.mrf.mxu0  ;;  %v1323_v63 = vpop.f32.mrf.mxu1 }
 0x176   :  { %1619 = vst [vmem:[%s3120_s3 + $0xe0] sm:$0xff] %v1491_v60  ;;  %1683 = vst [vmem:[%s3120_s3 + $0x2e0] sm:$0xff] %v1555_v61  ;;  %v1068_v0 = vadd.f32 %v2520_v55, %v1067_v62  ;;  %v1324_v1 = vadd.f32 %v2520_v55, %v1323_v63 }
 0x177   :  { %v1069_v2 = vpop.f32.mrf.mxu0  ;;  %v1325_v3 = vpop.f32.mrf.mxu1 }
 0x178   :  { %v1492_v4 = vmax.f32 %v1068_v0, 0.0  ;;  %v1556_v5 = vmax.f32 %v1324_v1, 0.0 }
 0x179   :  { %v1072_v6 = vpop.f32.mrf.mxu0  ;;  %v1328_v7 = vpop.f32.mrf.mxu1 }
 0x17a   :  { %1620 = vst [vmem:[%s3120_s3 + $0xe8] sm:$0xff] %v1492_v4  ;;  %1684 = vst [vmem:[%s3120_s3 + $0x2e8] sm:$0xff] %v1556_v5  ;;  %v1073_v8 = vadd.f32 %v2520_v55, %v1072_v6  ;;  %v1329_v9 = vadd.f32 %v2520_v55, %v1328_v7 }
 0x17b   :  { %v1074_v10 = vpop.f32.mrf.mxu0  ;;  %v1330_v11 = vpop.f32.mrf.mxu1 }
 0x17c   :  { %v1493_v12 = vmax.f32 %v1073_v8, 0.0  ;;  %v1557_v13 = vmax.f32 %v1329_v9, 0.0 }
 0x17d   :  { %v1075_v14 = vpop.f32.mrf.mxu0  ;;  %v1331_v15 = vpop.f32.mrf.mxu1 }
 0x17e   :  { %1621 = vst [vmem:[%s3120_s3 + $0xf0] sm:$0xff] %v1493_v12  ;;  %1685 = vst [vmem:[%s3120_s3 + $0x2f0] sm:$0xff] %v1557_v13  ;;  %v1076_v16 = vadd.f32 %v2520_v55, %v1075_v14  ;;  %v1332_v17 = vadd.f32 %v2520_v55, %v1331_v15 }
 0x17f   :  { %v1077_v18 = vpop.f32.mrf.mxu0  ;;  %v1333_v19 = vpop.f32.mrf.mxu1 }
 0x180   :  { %v1494_v20 = vmax.f32 %v1076_v16, 0.0  ;;  %v1558_v21 = vmax.f32 %v1332_v17, 0.0 }
 0x181   :  { %v1080_v22 = vpop.f32.mrf.mxu0  ;;  %v1336_v23 = vpop.f32.mrf.mxu1 }
 0x182   :  { %1622 = vst [vmem:[%s3120_s3 + $0xf8] sm:$0xff] %v1494_v20  ;;  %1686 = vst [vmem:[%s3120_s3 + $0x2f8] sm:$0xff] %v1558_v21  ;;  %v1081_v24 = vadd.f32 %v2520_v55, %v1080_v22  ;;  %v1337_v25 = vadd.f32 %v2520_v55, %v1336_v23 }
 0x183   :  { %v1082_v26 = vpop.f32.mrf.mxu0  ;;  %v1338_v27 = vpop.f32.mrf.mxu1 }
 0x184   :  { %v1495_v28 = vmax.f32 %v1081_v24, 0.0  ;;  %v1559_v29 = vmax.f32 %v1337_v25, 0.0 }
 0x185   :  { %v1083_v30 = vpop.f32.mrf.mxu0  ;;  %v1339_v31 = vpop.f32.mrf.mxu1 }
 0x186   :  { %1623 = vst [vmem:[%s3120_s3 + $0x100] sm:$0xff] %v1495_v28  ;;  %1687 = vst [vmem:[%s3120_s3 + $0x300] sm:$0xff] %v1559_v29  ;;  %v1084_v32 = vadd.f32 %v2520_v55, %v1083_v30  ;;  %v1340_v33 = vadd.f32 %v2520_v55, %v1339_v31 }
 0x187   :  { %v1085_v34 = vpop.f32.mrf.mxu0  ;;  %v1341_v35 = vpop.f32.mrf.mxu1 }
 0x188   :  { %v1496_v36 = vmax.f32 %v1084_v32, 0.0  ;;  %v1560_v37 = vmax.f32 %v1340_v33, 0.0 }
 0x189   :  { %v1088_v38 = vpop.f32.mrf.mxu0  ;;  %v1344_v39 = vpop.f32.mrf.mxu1 }
 0x18a   :  { %1624 = vst [vmem:[%s3120_s3 + $0x108] sm:$0xff] %v1496_v36  ;;  %1688 = vst [vmem:[%s3120_s3 + $0x308] sm:$0xff] %v1560_v37  ;;  %v1089_v40 = vadd.f32 %v2520_v55, %v1088_v38  ;;  %v1345_v41 = vadd.f32 %v2520_v55, %v1344_v39 }
 0x18b   :  { %v1090_v42 = vpop.f32.mrf.mxu0  ;;  %v1346_v43 = vpop.f32.mrf.mxu1 }
 0x18c   :  { %v1497_v44 = vmax.f32 %v1089_v40, 0.0  ;;  %v1561_v45 = vmax.f32 %v1345_v41, 0.0 }
 0x18d   :  { %v1091_v46 = vpop.f32.mrf.mxu0  ;;  %v1347_v47 = vpop.f32.mrf.mxu1 }
 0x18e   :  { %1625 = vst [vmem:[%s3120_s3 + $0x110] sm:$0xff] %v1497_v44  ;;  %1689 = vst [vmem:[%s3120_s3 + $0x310] sm:$0xff] %v1561_v45  ;;  %v1092_v48 = vadd.f32 %v2520_v55, %v1091_v46  ;;  %v1348_v49 = vadd.f32 %v2520_v55, %v1347_v47 }
 0x18f   :  { %v1093_v50 = vpop.f32.mrf.mxu0  ;;  %v1349_v51 = vpop.f32.mrf.mxu1 }
 0x190   :  { %v1498_v52 = vmax.f32 %v1092_v48, 0.0  ;;  %v1562_v53 = vmax.f32 %v1348_v49, 0.0 }
 0x191   :  { %v1096_v54 = vpop.f32.mrf.mxu0  ;;  %v1352_v56 = vpop.f32.mrf.mxu1 }
 0x192   :  { %1626 = vst [vmem:[%s3120_s3 + $0x118] sm:$0xff] %v1498_v52  ;;  %1690 = vst [vmem:[%s3120_s3 + $0x318] sm:$0xff] %v1562_v53  ;;  %v1097_v57 = vadd.f32 %v2520_v55, %v1096_v54  ;;  %v1353_v58 = vadd.f32 %v2520_v55, %v1352_v56 }
 0x193   :  { %v1098_v59 = vpop.f32.mrf.mxu0  ;;  %v1354_v60 = vpop.f32.mrf.mxu1 }
 0x194   :  { %v1499_v61 = vmax.f32 %v1097_v57, 0.0  ;;  %v1563_v62 = vmax.f32 %v1353_v58, 0.0 }
 0x195   :  { %v1099_v63 = vpop.f32.mrf.mxu0  ;;  %v1355_v0 = vpop.f32.mrf.mxu1 }
 0x196   :  { %1627 = vst [vmem:[%s3120_s3 + $0x120] sm:$0xff] %v1499_v61  ;;  %1691 = vst [vmem:[%s3120_s3 + $0x320] sm:$0xff] %v1563_v62  ;;  %v1100_v1 = vadd.f32 %v2520_v55, %v1099_v63  ;;  %v1356_v2 = vadd.f32 %v2520_v55, %v1355_v0 }
 0x197   :  { %v1101_v3 = vpop.f32.mrf.mxu0  ;;  %v1357_v4 = vpop.f32.mrf.mxu1 }
 0x198   :  { %v1500_v5 = vmax.f32 %v1100_v1, 0.0  ;;  %v1564_v6 = vmax.f32 %v1356_v2, 0.0 }
 0x199   :  { %v1104_v7 = vpop.f32.mrf.mxu0  ;;  %v1360_v8 = vpop.f32.mrf.mxu1 }
 0x19a   :  { %1628 = vst [vmem:[%s3120_s3 + $0x128] sm:$0xff] %v1500_v5  ;;  %1692 = vst [vmem:[%s3120_s3 + $0x328] sm:$0xff] %v1564_v6  ;;  %v1105_v9 = vadd.f32 %v2520_v55, %v1104_v7  ;;  %v1361_v10 = vadd.f32 %v2520_v55, %v1360_v8 }
 0x19b   :  { %v1106_v11 = vpop.f32.mrf.mxu0  ;;  %v1362_v12 = vpop.f32.mrf.mxu1 }
 0x19c   :  { %v1501_v13 = vmax.f32 %v1105_v9, 0.0  ;;  %v1565_v14 = vmax.f32 %v1361_v10, 0.0  ;;  %v2971_v10 = vld [vmem:[%s3119_s2] ss:$0 sm:$0xff] }
 0x19d   :  { %v1107_v15 = vpop.f32.mrf.mxu0  ;;  %v1363_v16 = vpop.f32.mrf.mxu1 }
 0x19e   :  { %1629 = vst [vmem:[%s3120_s3 + $0x130] sm:$0xff] %v1501_v13  ;;  %1693 = vst [vmem:[%s3120_s3 + $0x330] sm:$0xff] %v1565_v14  ;;  %v1108_v17 = vadd.f32 %v2520_v55, %v1107_v15  ;;  %v1364_v18 = vadd.f32 %v2520_v55, %v1363_v16 }
 0x19f   :  { %v1109_v19 = vpop.f32.mrf.mxu0  ;;  %v1365_v20 = vpop.f32.mrf.mxu1 }
 0x1a0   :  { %v1502_v21 = vmax.f32 %v1108_v17, 0.0  ;;  %v1566_v22 = vmax.f32 %v1364_v18, 0.0 }
 0x1a1   :  { %v1112_v23 = vpop.f32.mrf.mxu0  ;;  %v1368_v24 = vpop.f32.mrf.mxu1 }
 0x1a2   :  { %1630 = vst [vmem:[%s3120_s3 + $0x138] sm:$0xff] %v1502_v21  ;;  %1694 = vst [vmem:[%s3120_s3 + $0x338] sm:$0xff] %v1566_v22  ;;  %v1113_v25 = vadd.f32 %v2520_v55, %v1112_v23  ;;  %v1369_v26 = vadd.f32 %v2520_v55, %v1368_v24 }
 0x1a3   :  { %v1114_v27 = vpop.f32.mrf.mxu0  ;;  %v1370_v28 = vpop.f32.mrf.mxu1 }
 0x1a4   :  { %v1503_v29 = vmax.f32 %v1113_v25, 0.0  ;;  %v1567_v30 = vmax.f32 %v1369_v26, 0.0 }
 0x1a5   :  { %v1115_v31 = vpop.f32.mrf.mxu0  ;;  %v1371_v32 = vpop.f32.mrf.mxu1 }
 0x1a6   :  { %1631 = vst [vmem:[%s3120_s3 + $0x140] sm:$0xff] %v1503_v29  ;;  %1695 = vst [vmem:[%s3120_s3 + $0x340] sm:$0xff] %v1567_v30  ;;  %v1116_v33 = vadd.f32 %v2520_v55, %v1115_v31  ;;  %v1372_v34 = vadd.f32 %v2520_v55, %v1371_v32 }
 0x1a7   :  { %v1117_v35 = vpop.f32.mrf.mxu0  ;;  %v1373_v36 = vpop.f32.mrf.mxu1 }
 0x1a8   :  { %v1504_v37 = vmax.f32 %v1116_v33, 0.0  ;;  %v1568_v38 = vmax.f32 %v1372_v34, 0.0 }
 0x1a9   :  { %v1120_v39 = vpop.f32.mrf.mxu0  ;;  %v1376_v40 = vpop.f32.mrf.mxu1 }
 0x1aa   :  { %1632 = vst [vmem:[%s3120_s3 + $0x148] sm:$0xff] %v1504_v37  ;;  %1696 = vst [vmem:[%s3120_s3 + $0x348] sm:$0xff] %v1568_v38  ;;  %v1121_v41 = vadd.f32 %v2520_v55, %v1120_v39  ;;  %v1377_v42 = vadd.f32 %v2520_v55, %v1376_v40 }
 0x1ab   :  { %v1122_v43 = vpop.f32.mrf.mxu0  ;;  %v1378_v44 = vpop.f32.mrf.mxu1 }
 0x1ac   :  { %v1505_v45 = vmax.f32 %v1121_v41, 0.0  ;;  %v1569_v46 = vmax.f32 %v1377_v42, 0.0 }
 0x1ad   :  { %v1123_v47 = vpop.f32.mrf.mxu0  ;;  %v1379_v48 = vpop.f32.mrf.mxu1 }
 0x1ae   :  { %1633 = vst [vmem:[%s3120_s3 + $0x150] sm:$0xff] %v1505_v45  ;;  %1697 = vst [vmem:[%s3120_s3 + $0x350] sm:$0xff] %v1569_v46  ;;  %v1124_v49 = vadd.f32 %v2520_v55, %v1123_v47  ;;  %v1380_v50 = vadd.f32 %v2520_v55, %v1379_v48 }
 0x1af   :  { %v1125_v51 = vpop.f32.mrf.mxu0  ;;  %v1381_v52 = vpop.f32.mrf.mxu1 }
 0x1b0   :  { %v1506_v53 = vmax.f32 %v1124_v49, 0.0  ;;  %v1570_v54 = vmax.f32 %v1380_v50, 0.0 }
 0x1b1   :  { %v1128_v56 = vpop.f32.mrf.mxu0  ;;  %v1384_v57 = vpop.f32.mrf.mxu1 }
 0x1b2   :  { %1634 = vst [vmem:[%s3120_s3 + $0x158] sm:$0xff] %v1506_v53  ;;  %1698 = vst [vmem:[%s3120_s3 + $0x358] sm:$0xff] %v1570_v54  ;;  %v1129_v58 = vadd.f32 %v2520_v55, %v1128_v56  ;;  %v1385_v59 = vadd.f32 %v2520_v55, %v1384_v57 }
 0x1b3   :  { %v1130_v60 = vpop.f32.mrf.mxu0  ;;  %v1386_v61 = vpop.f32.mrf.mxu1 }
 0x1b4   :  { %v1507_v62 = vmax.f32 %v1129_v58, 0.0  ;;  %v1571_v63 = vmax.f32 %v1385_v59, 0.0 }
 0x1b5   :  { %v1131_v0 = vpop.f32.mrf.mxu0  ;;  %v1387_v1 = vpop.f32.mrf.mxu1 }
 0x1b6   :  { %1635 = vst [vmem:[%s3120_s3 + $0x160] sm:$0xff] %v1507_v62  ;;  %1699 = vst [vmem:[%s3120_s3 + $0x360] sm:$0xff] %v1571_v63  ;;  %v1132_v2 = vadd.f32 %v2520_v55, %v1131_v0  ;;  %v1388_v3 = vadd.f32 %v2520_v55, %v1387_v1 }
 0x1b7   :  { %v1133_v4 = vpop.f32.mrf.mxu0  ;;  %v1389_v5 = vpop.f32.mrf.mxu1 }
 0x1b8   :  { %v1508_v6 = vmax.f32 %v1132_v2, 0.0  ;;  %v1572_v7 = vmax.f32 %v1388_v3, 0.0 }
 0x1b9   :  { %v1136_v8 = vpop.f32.mrf.mxu0  ;;  %v1392_v9 = vpop.f32.mrf.mxu1 }
 0x1ba   :  { %1636 = vst [vmem:[%s3120_s3 + $0x168] sm:$0xff] %v1508_v6  ;;  %1700 = vst [vmem:[%s3120_s3 + $0x368] sm:$0xff] %v1572_v7  ;;  %v1137_v55 = vadd.f32 %v2971_v10, %v1136_v8  ;;  %v1393_v11 = vadd.f32 %v2971_v10, %v1392_v9 }
 0x1bb   :  { %v1138_v12 = vpop.f32.mrf.mxu0  ;;  %v1394_v13 = vpop.f32.mrf.mxu1 }
 0x1bc   :  { %v1509_v14 = vmax.f32 %v1137_v55, 0.0  ;;  %v1573_v15 = vmax.f32 %v1393_v11, 0.0 }
 0x1bd   :  { %v1139_v16 = vpop.f32.mrf.mxu0  ;;  %v1395_v17 = vpop.f32.mrf.mxu1 }
 0x1be   :  { %1637 = vst [vmem:[%s3120_s3 + $0x170] sm:$0xff] %v1509_v14  ;;  %1701 = vst [vmem:[%s3120_s3 + $0x370] sm:$0xff] %v1573_v15  ;;  %v1140_v18 = vadd.f32 %v2971_v10, %v1139_v16  ;;  %v1396_v19 = vadd.f32 %v2971_v10, %v1395_v17 }
 0x1bf   :  { %v1141_v20 = vpop.f32.mrf.mxu0  ;;  %v1397_v21 = vpop.f32.mrf.mxu1 }
 0x1c0   :  { %v1510_v22 = vmax.f32 %v1140_v18, 0.0  ;;  %v1574_v23 = vmax.f32 %v1396_v19, 0.0 }
 0x1c1   :  { %v1144_v24 = vpop.f32.mrf.mxu0  ;;  %v1400_v25 = vpop.f32.mrf.mxu1 }
 0x1c2   :  { %1638 = vst [vmem:[%s3120_s3 + $0x178] sm:$0xff] %v1510_v22  ;;  %1702 = vst [vmem:[%s3120_s3 + $0x378] sm:$0xff] %v1574_v23  ;;  %v1145_v26 = vadd.f32 %v2971_v10, %v1144_v24  ;;  %v1401_v27 = vadd.f32 %v2971_v10, %v1400_v25 }
 0x1c3   :  { %v1146_v28 = vpop.f32.mrf.mxu0  ;;  %v1402_v29 = vpop.f32.mrf.mxu1 }
 0x1c4   :  { %v1511_v30 = vmax.f32 %v1145_v26, 0.0  ;;  %v1575_v31 = vmax.f32 %v1401_v27, 0.0 }
 0x1c5   :  { %v1147_v32 = vpop.f32.mrf.mxu0  ;;  %v1403_v33 = vpop.f32.mrf.mxu1 }
 0x1c6   :  { %1639 = vst [vmem:[%s3120_s3 + $0x180] sm:$0xff] %v1511_v30  ;;  %1703 = vst [vmem:[%s3120_s3 + $0x380] sm:$0xff] %v1575_v31  ;;  %v1148_v34 = vadd.f32 %v2971_v10, %v1147_v32  ;;  %v1404_v35 = vadd.f32 %v2971_v10, %v1403_v33 }
 0x1c7   :  { %v1149_v36 = vpop.f32.mrf.mxu0  ;;  %v1405_v37 = vpop.f32.mrf.mxu1 }
 0x1c8   :  { %v1512_v38 = vmax.f32 %v1148_v34, 0.0  ;;  %v1576_v39 = vmax.f32 %v1404_v35, 0.0 }
 0x1c9   :  { %v1152_v40 = vpop.f32.mrf.mxu0  ;;  %v1408_v41 = vpop.f32.mrf.mxu1 }
 0x1ca   :  { %1640 = vst [vmem:[%s3120_s3 + $0x188] sm:$0xff] %v1512_v38  ;;  %1704 = vst [vmem:[%s3120_s3 + $0x388] sm:$0xff] %v1576_v39  ;;  %v1153_v42 = vadd.f32 %v2971_v10, %v1152_v40  ;;  %v1409_v43 = vadd.f32 %v2971_v10, %v1408_v41 }
 0x1cb   :  { %v1154_v44 = vpop.f32.mrf.mxu0  ;;  %v1410_v45 = vpop.f32.mrf.mxu1 }
 0x1cc   :  { %v1513_v46 = vmax.f32 %v1153_v42, 0.0  ;;  %v1577_v47 = vmax.f32 %v1409_v43, 0.0 }
 0x1cd   :  { %v1155_v48 = vpop.f32.mrf.mxu0  ;;  %v1411_v49 = vpop.f32.mrf.mxu1 }
 0x1ce   :  { %1641 = vst [vmem:[%s3120_s3 + $0x190] sm:$0xff] %v1513_v46  ;;  %1705 = vst [vmem:[%s3120_s3 + $0x390] sm:$0xff] %v1577_v47  ;;  %v1156_v50 = vadd.f32 %v2971_v10, %v1155_v48  ;;  %v1412_v51 = vadd.f32 %v2971_v10, %v1411_v49 }
 0x1cf   :  { %v1157_v52 = vpop.f32.mrf.mxu0  ;;  %v1413_v53 = vpop.f32.mrf.mxu1 }
 0x1d0   :  { %v1514_v54 = vmax.f32 %v1156_v50, 0.0  ;;  %v1578_v56 = vmax.f32 %v1412_v51, 0.0 }
 0x1d1   :  { %v1160_v57 = vpop.f32.mrf.mxu0  ;;  %v1416_v58 = vpop.f32.mrf.mxu1 }
 0x1d2   :  { %1642 = vst [vmem:[%s3120_s3 + $0x198] sm:$0xff] %v1514_v54  ;;  %1706 = vst [vmem:[%s3120_s3 + $0x398] sm:$0xff] %v1578_v56  ;;  %v1161_v59 = vadd.f32 %v2971_v10, %v1160_v57  ;;  %v1417_v60 = vadd.f32 %v2971_v10, %v1416_v58 }
 0x1d3   :  { %v1162_v61 = vpop.f32.mrf.mxu0  ;;  %v1418_v62 = vpop.f32.mrf.mxu1 }
 0x1d4   :  { %v1515_v63 = vmax.f32 %v1161_v59, 0.0  ;;  %v1579_v0 = vmax.f32 %v1417_v60, 0.0 }
 0x1d5   :  { %v1163_v1 = vpop.f32.mrf.mxu0  ;;  %v1419_v2 = vpop.f32.mrf.mxu1 }
 0x1d6   :  { %1643 = vst [vmem:[%s3120_s3 + $0x1a0] sm:$0xff] %v1515_v63  ;;  %1707 = vst [vmem:[%s3120_s3 + $0x3a0] sm:$0xff] %v1579_v0  ;;  %v1164_v3 = vadd.f32 %v2971_v10, %v1163_v1  ;;  %v1420_v4 = vadd.f32 %v2971_v10, %v1419_v2 }
 0x1d7   :  { %v1165_v5 = vpop.f32.mrf.mxu0  ;;  %v1421_v6 = vpop.f32.mrf.mxu1 }
 0x1d8   :  { %v1516_v7 = vmax.f32 %v1164_v3, 0.0  ;;  %v1580_v8 = vmax.f32 %v1420_v4, 0.0 }
 0x1d9   :  { %v1168_v9 = vpop.f32.mrf.mxu0  ;;  %v1424_v55 = vpop.f32.mrf.mxu1 }
 0x1da   :  { %1644 = vst [vmem:[%s3120_s3 + $0x1a8] sm:$0xff] %v1516_v7  ;;  %1708 = vst [vmem:[%s3120_s3 + $0x3a8] sm:$0xff] %v1580_v8  ;;  %v1169_v11 = vadd.f32 %v2971_v10, %v1168_v9  ;;  %v1425_v12 = vadd.f32 %v2971_v10, %v1424_v55 }
 0x1db   :  { %v1170_v13 = vpop.f32.mrf.mxu0  ;;  %v1426_v14 = vpop.f32.mrf.mxu1 }
 0x1dc   :  { %v1517_v15 = vmax.f32 %v1169_v11, 0.0  ;;  %v1581_v16 = vmax.f32 %v1425_v12, 0.0 }
 0x1dd   :  { %v1171_v17 = vpop.f32.mrf.mxu0  ;;  %v1427_v18 = vpop.f32.mrf.mxu1 }
 0x1de   :  { %1645 = vst [vmem:[%s3120_s3 + $0x1b0] sm:$0xff] %v1517_v15  ;;  %1709 = vst [vmem:[%s3120_s3 + $0x3b0] sm:$0xff] %v1581_v16  ;;  %v1172_v19 = vadd.f32 %v2971_v10, %v1171_v17  ;;  %v1428_v20 = vadd.f32 %v2971_v10, %v1427_v18 }
 0x1df   :  { %v1173_v21 = vpop.f32.mrf.mxu0  ;;  %v1429_v22 = vpop.f32.mrf.mxu1 }
 0x1e0   :  { %v1518_v23 = vmax.f32 %v1172_v19, 0.0  ;;  %v1582_v24 = vmax.f32 %v1428_v20, 0.0 }
 0x1e1   :  { %v1176_v25 = vpop.f32.mrf.mxu0  ;;  %v1432_v26 = vpop.f32.mrf.mxu1 }
 0x1e2   :  { %1646 = vst [vmem:[%s3120_s3 + $0x1b8] sm:$0xff] %v1518_v23  ;;  %1710 = vst [vmem:[%s3120_s3 + $0x3b8] sm:$0xff] %v1582_v24  ;;  %v1177_v27 = vadd.f32 %v2971_v10, %v1176_v25  ;;  %v1433_v28 = vadd.f32 %v2971_v10, %v1432_v26 }
 0x1e3   :  { %v1178_v29 = vpop.f32.mrf.mxu0  ;;  %v1434_v30 = vpop.f32.mrf.mxu1 }
 0x1e4   :  { %v1519_v31 = vmax.f32 %v1177_v27, 0.0  ;;  %v1583_v32 = vmax.f32 %v1433_v28, 0.0 }
 0x1e5   :  { %v1179_v33 = vpop.f32.mrf.mxu0  ;;  %v1435_v34 = vpop.f32.mrf.mxu1 }
 0x1e6   :  { %1647 = vst [vmem:[%s3120_s3 + $0x1c0] sm:$0xff] %v1519_v31  ;;  %1711 = vst [vmem:[%s3120_s3 + $0x3c0] sm:$0xff] %v1583_v32  ;;  %v1180_v35 = vadd.f32 %v2971_v10, %v1179_v33  ;;  %v1436_v36 = vadd.f32 %v2971_v10, %v1435_v34 }
 0x1e7   :  { %v1181_v37 = vpop.f32.mrf.mxu0  ;;  %v1437_v38 = vpop.f32.mrf.mxu1 }
 0x1e8   :  { %v1520_v39 = vmax.f32 %v1180_v35, 0.0  ;;  %v1584_v40 = vmax.f32 %v1436_v36, 0.0 }
 0x1e9   :  { %v1184_v41 = vpop.f32.mrf.mxu0  ;;  %v1440_v42 = vpop.f32.mrf.mxu1 }
 0x1ea   :  { %1648 = vst [vmem:[%s3120_s3 + $0x1c8] sm:$0xff] %v1520_v39  ;;  %1712 = vst [vmem:[%s3120_s3 + $0x3c8] sm:$0xff] %v1584_v40  ;;  %v1185_v43 = vadd.f32 %v2971_v10, %v1184_v41  ;;  %v1441_v44 = vadd.f32 %v2971_v10, %v1440_v42 }
 0x1eb   :  { %v1186_v45 = vpop.f32.mrf.mxu0  ;;  %v1442_v46 = vpop.f32.mrf.mxu1 }
 0x1ec   :  { %v1521_v47 = vmax.f32 %v1185_v43, 0.0  ;;  %v1585_v48 = vmax.f32 %v1441_v44, 0.0 }
 0x1ed   :  { %v1187_v49 = vpop.f32.mrf.mxu0  ;;  %v1443_v50 = vpop.f32.mrf.mxu1 }
 0x1ee   :  { %1649 = vst [vmem:[%s3120_s3 + $0x1d0] sm:$0xff] %v1521_v47  ;;  %1713 = vst [vmem:[%s3120_s3 + $0x3d0] sm:$0xff] %v1585_v48  ;;  %v1188_v51 = vadd.f32 %v2971_v10, %v1187_v49  ;;  %v1444_v52 = vadd.f32 %v2971_v10, %v1443_v50 }
 0x1ef   :  { %v1189_v53 = vpop.f32.mrf.mxu0  ;;  %v1445_v54 = vpop.f32.mrf.mxu1 }
 0x1f0   :  { %v1522_v56 = vmax.f32 %v1188_v51, 0.0  ;;  %v1586_v57 = vmax.f32 %v1444_v52, 0.0 }
 0x1f1   :  { %v1192_v58 = vpop.f32.mrf.mxu0  ;;  %v1448_v59 = vpop.f32.mrf.mxu1 }
 0x1f2   :  { %1650 = vst [vmem:[%s3120_s3 + $0x1d8] sm:$0xff] %v1522_v56  ;;  %1714 = vst [vmem:[%s3120_s3 + $0x3d8] sm:$0xff] %v1586_v57  ;;  %v1193_v60 = vadd.f32 %v2971_v10, %v1192_v58  ;;  %v1449_v61 = vadd.f32 %v2971_v10, %v1448_v59 }
 0x1f3   :  { %v1194_v62 = vpop.f32.mrf.mxu0  ;;  %v1450_v63 = vpop.f32.mrf.mxu1 }
 0x1f4   :  { %v1523_v0 = vmax.f32 %v1193_v60, 0.0  ;;  %v1587_v1 = vmax.f32 %v1449_v61, 0.0 }
 0x1f5   :  { %v1195_v2 = vpop.f32.mrf.mxu0  ;;  %v1451_v3 = vpop.f32.mrf.mxu1 }
 0x1f6   :  { %1651 = vst [vmem:[%s3120_s3 + $0x1e0] sm:$0xff] %v1523_v0  ;;  %1715 = vst [vmem:[%s3120_s3 + $0x3e0] sm:$0xff] %v1587_v1  ;;  %v1196_v4 = vadd.f32 %v2971_v10, %v1195_v2  ;;  %v1452_v5 = vadd.f32 %v2971_v10, %v1451_v3 }
 0x1f7   :  { %v1197_v6 = vpop.f32.mrf.mxu0  ;;  %v1453_v7 = vpop.f32.mrf.mxu1 }
 0x1f8   :  { %v1524_v8 = vmax.f32 %v1196_v4, 0.0  ;;  %v1588_v9 = vmax.f32 %v1452_v5, 0.0 }
 0x1f9   :  { %v1200_v55 = vpop.f32.mrf.mxu0  ;;  %v1456_v11 = vpop.f32.mrf.mxu1 }
 0x1fa   :  { %1652 = vst [vmem:[%s3120_s3 + $0x1e8] sm:$0xff] %v1524_v8  ;;  %1716 = vst [vmem:[%s3120_s3 + $0x3e8] sm:$0xff] %v1588_v9  ;;  %v1201_v12 = vadd.f32 %v2971_v10, %v1200_v55  ;;  %v1457_v13 = vadd.f32 %v2971_v10, %v1456_v11 }
 0x1fb   :  { %v1202_v14 = vpop.f32.mrf.mxu0  ;;  %v1458_v15 = vpop.f32.mrf.mxu1 }
 0x1fc   :  { %v1525_v16 = vmax.f32 %v1201_v12, 0.0  ;;  %v1589_v17 = vmax.f32 %v1457_v13, 0.0 }
 0x1fd   :  { %v1203_v18 = vpop.f32.mrf.mxu0  ;;  %v1459_v19 = vpop.f32.mrf.mxu1 }
 0x1fe   :  { %1653 = vst [vmem:[%s3120_s3 + $0x1f0] sm:$0xff] %v1525_v16  ;;  %1717 = vst [vmem:[%s3120_s3 + $0x3f0] sm:$0xff] %v1589_v17  ;;  %v1204_v20 = vadd.f32 %v2971_v10, %v1203_v18  ;;  %v1460_v21 = vadd.f32 %v2971_v10, %v1459_v19 }
 0x1ff   :  { %v1205_v22 = vpop.f32.mrf.mxu0  ;;  %v1461_v23 = vpop.f32.mrf.mxu1 }
 0x200   :  { %v1526_v24 = vmax.f32 %v1204_v20, 0.0  ;;  %v1590_v25 = vmax.f32 %v1460_v21, 0.0 }
 0x202   :  { %1654 = vst [vmem:[%s3120_s3 + $0x1f8] sm:$0xff] %v1526_v24  ;;  %1718 = vst [vmem:[%s3120_s3 + $0x3f8] sm:$0xff] %v1590_v25 }

</bundles_post_ra>
